<compile_context>
chip_gen: v6e
topology: v6e:2x2x1
jax: 0.10.0
libtpu: 0.0.40
codegen_flags: <defaults>
</compile_context>

<pallas_src>
import jax
import jax.numpy as jnp
import numpy as np
from jax.experimental import pallas as pl
from jax.experimental.pallas import tpu as pltpu

HIDDEN = 32        # self.hidden_size
NUM_LAYERS = 2     # self.num_layers (hard-coded 2-layer recurrence below)
N_MID = 128        # fc hidden width
N_OUT = 20         # fc output width
OUT_PAD = 128      # lane-padded output width (slice back to N_OUT when needed)


def _round_up8(x):
    return ((x + 7) // 8) * 8


def _slab_layout(n_in):
    """Row layout of the packed parameter slab (all sections 8-row aligned)."""
    lay, r = {}, 0
    lay["wih0"] = (r, n_in);  r += _round_up8(n_in)   # (n_in, 4H)
    lay["whh1"] = (r, HIDDEN); r += HIDDEN            # (H, 4H)
    lay["fcw1"] = (r, HIDDEN); r += HIDDEN            # (H, 128)
    lay["fcw2"] = (r, N_MID);  r += N_MID             # (128, OUT_PAD)
    lay["bias"] = (r, 4);      r += 8                 # rows: b0, b1, fcb1, fcb2
    lay["rows"] = r
    return lay


# ----------------------------------------------------------------------------
# Pallas kernel: whole forward (LSTM recurrence + MLP head) in VMEM.
# Tiny footprint -> single gridless invocation, full-array VMEM blocks,
# fully-unrolled time recurrence.
# ----------------------------------------------------------------------------
def qnet_kernel(x_ref,      # (B, T, n_in)  original batch-major input
                slab_ref,   # (rows, 128)   packed weights/biases (see _slab_layout)
                wcomb_ref,  # (H, 8H)       [W_hh0^T | W_ih1^T], g-cols pre-scaled
                out_ref):   # (B, OUT_PAD)  lane-padded logits
    B, T, n_in = x_ref.shape
    H = HIDDEN
    G = 4 * H  # 128

    # ---- unpack the packed parameter slab (static, 8-aligned sublane slices) ----
    lay = _slab_layout(n_in)
    r, n = lay["wih0"]; wih0 = slab_ref[r:r + n, :]        # (n_in, 4H)
    r, n = lay["whh1"]; whh1 = slab_ref[r:r + n, :]        # (H, 4H)
    r, n = lay["fcw1"]; fcw1 = slab_ref[r:r + n, :]        # (H, 128)
    r, n = lay["fcw2"]; fcw2 = slab_ref[r:r + n, :]        # (128, OUT_PAD)
    rb = lay["bias"][0]
    bias_blk = slab_ref[rb:rb + 8, :]                      # one aligned (8,128) load
    b0 = bias_blk[0:1, :]
    b1 = bias_blk[1:2, :]
    fcb1 = bias_blk[2:3, :]
    fcb2 = bias_blk[3:4, :]
    wcomb = wcomb_ref[...]                                 # (H, 8H) = (32, 256)

    # ---- hoisted layer-0 input projection over ALL timesteps (one matmul) ----
    # x is batch-major; reshape keeps rows b*T+t, then view as (B, T, 4H) so a
    # per-step slice is just sublane t of each batch tile (off the critical path).
    x_flat = x_ref[...].reshape(B * T, n_in)
    xz0 = jnp.dot(x_flat, wih0, preferred_element_type=jnp.float32) + b0
    xz0 = xz0.reshape(B, T, G)

    b1b = jnp.broadcast_to(b1, (B, G))                     # hoist broadcast (no CSE in loop)

    def cell(z, c=None):
        # PyTorch gate order (i, f, g, o). The g-gate columns of every weight /
        # bias feeding z were pre-scaled by 2 at prep time, so
        # tanh(g_orig) == 2*sigmoid(z_g) - 1: ONE full-width sigmoid, no tanh(z).
        sig = jax.nn.sigmoid(z)
        i = sig[:, 0 * H:1 * H]
        f = sig[:, 1 * H:2 * H]
        g = 2.0 * sig[:, 2 * H:3 * H] - 1.0
        o = sig[:, 3 * H:4 * H]
        c_new = i * g if c is None else f * c + i * g
        return o * jnp.tanh(c_new), c_new                  # tanh only on (B, H)

    # ---- t = 0, peeled: h/c are all zero => no h-projection matmuls ----
    h0, c0 = cell(xz0[:, 0, :])
    # One 256-lane MXU push: lanes [0:4H] -> next step's z0 h-term,
    #                        lanes [4H:8H] -> this step's z1 x-term.
    hp = jnp.dot(h0, wcomb, preferred_element_type=jnp.float32)
    h1, c1 = cell(hp[:, G:] + b1b)
    if T > 1:
        hh1 = jnp.dot(h1, whh1, preferred_element_type=jnp.float32)  # off critical path

    # ---- t = 1 .. T-1, fully unrolled (T is small & static) ----
    # TODO(synk): if T ever grows beyond ~16-32, switch to lax.fori_loop with a
    # small unroll factor instead of a full Python unroll.
    for t in range(1, T):
        z0 = xz0[:, t, :] + hp[:, :G]
        h0, c0 = cell(z0, c0)
        hp = jnp.dot(h0, wcomb, preferred_element_type=jnp.float32)
        z1 = hp[:, G:] + hh1 + b1b
        h1, c1 = cell(z1, c1)
        if t + 1 < T:
            # depends only on h1, so the scheduler can overlap it with the
            # next step's cell0 / Wcomb-matmul chain
            hh1 = jnp.dot(h1, whh1, preferred_element_type=jnp.float32)

    # ---- MLP head: Linear(32,128) -> ReLU -> Linear(128, n_out[padded]) ----
    hid = jnp.maximum(
        jnp.dot(h1, fcw1, preferred_element_type=jnp.float32) + fcb1, 0.0)
    out_ref[...] = (jnp.dot(hid, fcw2, preferred_element_type=jnp.float32)
                    + fcb2)                                # lane-dense (B, 128) store


# ----------------------------------------------------------------------------
# Parameter construction (PyTorch-shaped), then one-time kernel prep:
# transpose, fuse biases, 2x-scale the g-gate columns (tanh fold), fuse
# W_hh0/W_ih1 into Wcomb, lane-pad fc2, and pack everything into one slab.
# ----------------------------------------------------------------------------
def init_torch_params(key, n_in):
    ks = jax.random.split(key, 12)
    H = HIDDEN

    def unif(k, shape, bound):
        return jax.random.uniform(k, shape, jnp.float32, -bound, bound)

    lstm_bound = 1.0 / np.sqrt(H)
    fc2_bound = 1.0 / np.sqrt(N_MID)
    return dict(
        w_ih0=unif(ks[0], (4 * H, n_in), lstm_bound),
        w_hh0=unif(ks[1], (4 * H, H), lstm_bound),
        b_ih0=unif(ks[2], (4 * H,), lstm_bound),
        b_hh0=unif(ks[3], (4 * H,), lstm_bound),
        w_ih1=unif(ks[4], (4 * H, H), lstm_bound),
        w_hh1=unif(ks[5], (4 * H, H), lstm_bound),
        b_ih1=unif(ks[6], (4 * H,), lstm_bound),
        b_hh1=unif(ks[7], (4 * H,), lstm_bound),
        fc1_w=unif(ks[8], (N_MID, H), lstm_bound),
        fc1_b=unif(ks[9], (N_MID,), lstm_bound),
        fc2_w=unif(ks[10], (N_OUT, N_MID), fc2_bound),
        fc2_b=unif(ks[11], (N_OUT,), fc2_bound),
    )


def prep_kernel_params(raw):
    """One-time layout prep (not on the per-call path)."""
    H = HIDDEN
    n_in = raw["w_ih0"].shape[1]

    def scale_g(w):
        # Scale the g-gate pre-activation (last-axis slice 2H:3H) by 2 so the
        # kernel can compute tanh(g) as 2*sigmoid(z_g) - 1.
        return jnp.asarray(w, jnp.float32).at[..., 2 * H:3 * H].multiply(2.0)

    wih0_t = scale_g(raw["w_ih0"].T)                        # (n_in, 4H)
    whh0_t = scale_g(raw["w_hh0"].T)                        # (H, 4H)
    wih1_t = scale_g(raw["w_ih1"].T)                        # (H, 4H)
    whh1_t = scale_g(raw["w_hh1"].T)                        # (H, 4H)
    b0 = scale_g(raw["b_ih0"] + raw["b_hh0"])               # (4H,)
    b1 = scale_g(raw["b_ih1"] + raw["b_hh1"])               # (4H,)
    fcw1_t = jnp.asarray(raw["fc1_w"].T, jnp.float32)       # (H, 128)
    fcb1 = jnp.asarray(raw["fc1_b"], jnp.float32)           # (128,)
    fcw2_t = jnp.zeros((N_MID, OUT_PAD), jnp.float32).at[:, :N_OUT].set(raw["fc2_w"].T)
    fcb2 = jnp.zeros((OUT_PAD,), jnp.float32).at[:N_OUT].set(raw["fc2_b"])

    wcomb = jnp.concatenate([whh0_t, wih1_t], axis=1)       # (H, 8H) = (32, 256)

    lay = _slab_layout(n_in)
    slab = jnp.zeros((lay["rows"], OUT_PAD), jnp.float32)
    r, n = lay["wih0"]; slab = slab.at[r:r + n, :].set(wih0_t)
    r, n = lay["whh1"]; slab = slab.at[r:r + n, :].set(whh1_t)
    r, n = lay["fcw1"]; slab = slab.at[r:r + n, :].set(fcw1_t)
    r, n = lay["fcw2"]; slab = slab.at[r:r + n, :].set(fcw2_t)
    rb = lay["bias"][0]
    slab = slab.at[rb + 0, :].set(b0)
    slab = slab.at[rb + 1, :].set(b1)
    slab = slab.at[rb + 2, :].set(fcb1)
    slab = slab.at[rb + 3, :].set(fcb2)
    return dict(slab=slab, wcomb=wcomb)


# ----------------------------------------------------------------------------
# Wrappers. `qnet_forward_padded` does zero extra XLA ops besides the (free)
# dim-promotion reshape and returns the lane-padded (B, 128) slab;
# `qnet_forward` additionally slices to the PyTorch-visible (B, n_out).
# ----------------------------------------------------------------------------
def _promote(state):
    if state.ndim == 1:
        state = state[None, None, :]     # (1, 1, n_in)
    elif state.ndim == 2:
        state = state[:, None, :]        # (B, 1, n_in)
    return state.astype(jnp.float32)


@jax.jit
def qnet_forward_padded(state, slab, wcomb):
    state = _promote(state)
    B = state.shape[0]
    vmem = pl.BlockSpec(memory_space=pltpu.MemorySpace.VMEM)
    return pl.pallas_call(
        qnet_kernel,
        out_shape=jax.ShapeDtypeStruct((B, OUT_PAD), jnp.float32),
        in_specs=[vmem, vmem, vmem],
        out_specs=vmem,
    )(state, slab, wcomb)


@jax.jit
def qnet_forward(state, slab, wcomb):
    return qnet_forward_padded(state, slab, wcomb)[:, :N_OUT]


# ----------------------------------------------------------------------------
# Pure-JAX reference with PyTorch LSTM semantics (raw, un-transposed,
# un-scaled weights) — validates both the kernel math and the prep step.
# ----------------------------------------------------------------------------
def qnet_reference(state, raw):
    state = _promote(jnp.asarray(state))
    B, T, _ = state.shape
    H = HIDDEN

    def cell(x_t, h, c, w_ih, w_hh, b_ih, b_hh):
        z = x_t @ w_ih.T + b_ih + h @ w_hh.T + b_hh
        i = jax.nn.sigmoid(z[:, 0 * H:1 * H])
        f = jax.nn.sigmoid(z[:, 1 * H:2 * H])
        g = jnp.tanh(z[:, 2 * H:3 * H])
        o = jax.nn.sigmoid(z[:, 3 * H:4 * H])
        c = f * c + i * g
        h = o * jnp.tanh(c)
        return h, c

    h0 = c0 = h1 = c1 = jnp.zeros((B, H), jnp.float32)
    for t in range(T):
        x_t = state[:, t, :]
        h0, c0 = cell(x_t, h0, c0, raw["w_ih0"], raw["w_hh0"], raw["b_ih0"], raw["b_hh0"])
        h1, c1 = cell(h0, h1, c1, raw["w_ih1"], raw["w_hh1"], raw["b_ih1"], raw["b_hh1"])
    hid = jnp.maximum(h1 @ raw["fc1_w"].T + raw["fc1_b"], 0.0)
    return hid @ raw["fc2_w"].T + raw["fc2_b"]


if __name__ == "__main__":
    B, T, N_IN = 2, 8, 16
    key = jax.random.PRNGKey(0)
    k_param, k_x = jax.random.split(key)

    raw = init_torch_params(k_param, N_IN)
    kp = prep_kernel_params(raw)
    x = jax.random.normal(k_x, (B, T, N_IN), jnp.float32)

    out = jax.block_until_ready(qnet_forward(x, kp["slab"], kp["wcomb"]))
    ref = qnet_reference(x, raw)

    assert out.shape == (B, N_OUT), out.shape
    np.testing.assert_allclose(np.asarray(out), np.asarray(ref), rtol=2e-5, atol=2e-5)

    print("KERNEL_OK")
</pallas_src>

<mosaic_0001>
module attributes {stable_mosaic.version = 11 : i64} {
  func.func @qnet_kernel(%arg0: memref<2x8x16xf32, #tpu.memory_space<vmem>>, %arg1: memref<216x128xf32, #tpu.memory_space<vmem>>, %arg2: memref<32x256xf32, #tpu.memory_space<vmem>>, %arg3: memref<2x128xf32, #tpu.memory_space<vmem>>) attributes {dimension_semantics = [], scalar_prefetch = 0 : i64, scratch_operands = 0 : i64, tpu.core_type = #tpu.core_type<tc>} {
    %c0 = arith.constant 0 : index
    %c0_0 = arith.constant 0 : index
    %0 = vector.load %arg1[%c0, %c0_0] : memref<216x128xf32, #tpu.memory_space<vmem>>, vector<16x128xf32>
    %c16 = arith.constant 16 : index
    %c0_1 = arith.constant 0 : index
    %1 = vector.load %arg1[%c16, %c0_1] : memref<216x128xf32, #tpu.memory_space<vmem>>, vector<32x128xf32>
    %c48 = arith.constant 48 : index
    %c0_2 = arith.constant 0 : index
    %2 = vector.load %arg1[%c48, %c0_2] : memref<216x128xf32, #tpu.memory_space<vmem>>, vector<32x128xf32>
    %c80 = arith.constant 80 : index
    %c0_3 = arith.constant 0 : index
    %3 = vector.load %arg1[%c80, %c0_3] : memref<216x128xf32, #tpu.memory_space<vmem>>, vector<128x128xf32>
    %c208 = arith.constant 208 : index
    %c0_4 = arith.constant 0 : index
    %4 = vector.load %arg1[%c208, %c0_4] : memref<216x128xf32, #tpu.memory_space<vmem>>, vector<8x128xf32>
    %5 = vector.extract_strided_slice %4 {offsets = [0, 0], sizes = [1, 128], strides = [1, 1]} : vector<8x128xf32> to vector<1x128xf32>
    %6 = vector.extract_strided_slice %4 {offsets = [1, 0], sizes = [1, 128], strides = [1, 1]} : vector<8x128xf32> to vector<1x128xf32>
    %7 = vector.extract_strided_slice %4 {offsets = [2, 0], sizes = [1, 128], strides = [1, 1]} : vector<8x128xf32> to vector<1x128xf32>
    %8 = vector.extract_strided_slice %4 {offsets = [3, 0], sizes = [1, 128], strides = [1, 1]} : vector<8x128xf32> to vector<1x128xf32>
    %c0_5 = arith.constant 0 : index
    %c0_6 = arith.constant 0 : index
    %9 = vector.load %arg2[%c0_5, %c0_6] : memref<32x256xf32, #tpu.memory_space<vmem>>, vector<32x256xf32>
    %c0_7 = arith.constant 0 : index
    %c0_8 = arith.constant 0 : index
    %c0_9 = arith.constant 0 : index
    %10 = vector.load %arg0[%c0_7, %c0_8, %c0_9] : memref<2x8x16xf32, #tpu.memory_space<vmem>>, vector<2x8x16xf32>
    %11 = vector.shape_cast %10 : vector<2x8x16xf32> to vector<16x16xf32>
    %cst = arith.constant dense<0.000000e+00> : vector<16x128xf32>
    %12 = tpu.matmul %11, %0, %cst {dimension_numbers = #tpu.dot_dimension_numbers<[1], [0], [0], [1], [0, 0, 1, 1], [], []>} : vector<16x16xf32>, vector<16x128xf32>, vector<16x128xf32> -> vector<16x128xf32>
    %13 = vector.broadcast %5 : vector<1x128xf32> to vector<16x128xf32>
    %14 = arith.addf %12, %13 : vector<16x128xf32>
    %15 = vector.shape_cast %14 : vector<16x128xf32> to vector<2x8x128xf32>
    %16 = vector.shape_cast %6 : vector<1x128xf32> to vector<1x128xf32>
    %17 = vector.broadcast %16 : vector<1x128xf32> to vector<2x128xf32>
    %18 = vector.extract_strided_slice %15 {offsets = [0, 0, 0], sizes = [2, 1, 128], strides = [1, 1, 1]} : vector<2x8x128xf32> to vector<2x1x128xf32>
    %19 = vector.shape_cast %18 : vector<2x1x128xf32> to vector<2x128xf32>
    %20 = arith.negf %19 : vector<2x128xf32>
    %21 = math.exp %20 : vector<2x128xf32>
    %cst_10 = arith.constant 1.000000e+00 : f32
    %22 = vector.broadcast %cst_10 : f32 to vector<2x128xf32>
    %23 = arith.addf %22, %21 : vector<2x128xf32>
    %24 = arith.divf %22, %23 : vector<2x128xf32>
    %25 = vector.extract_strided_slice %24 {offsets = [0, 0], sizes = [2, 32], strides = [1, 1]} : vector<2x128xf32> to vector<2x32xf32>
    %26 = vector.extract_strided_slice %24 {offsets = [0, 64], sizes = [2, 32], strides = [1, 1]} : vector<2x128xf32> to vector<2x32xf32>
    %cst_11 = arith.constant 2.000000e+00 : f32
    %27 = vector.broadcast %cst_11 : f32 to vector<2x32xf32>
    %28 = arith.mulf %27, %26 : vector<2x32xf32>
    %cst_12 = arith.constant 1.000000e+00 : f32
    %29 = vector.broadcast %cst_12 : f32 to vector<2x32xf32>
    %30 = arith.subf %28, %29 : vector<2x32xf32>
    %31 = vector.extract_strided_slice %24 {offsets = [0, 96], sizes = [2, 32], strides = [1, 1]} : vector<2x128xf32> to vector<2x32xf32>
    %32 = arith.mulf %25, %30 : vector<2x32xf32>
    %33 = math.tanh %32 : vector<2x32xf32>
    %34 = arith.mulf %31, %33 : vector<2x32xf32>
    %cst_13 = arith.constant dense<0.000000e+00> : vector<2x256xf32>
    %35 = tpu.matmul %34, %9, %cst_13 {dimension_numbers = #tpu.dot_dimension_numbers<[1], [0], [0], [1], [0, 0, 1, 1], [], []>} : vector<2x32xf32>, vector<32x256xf32>, vector<2x256xf32> -> vector<2x256xf32>
    %36 = vector.extract_strided_slice %35 {offsets = [0, 128], sizes = [2, 128], strides = [1, 1]} : vector<2x256xf32> to vector<2x128xf32>
    %37 = arith.addf %36, %17 : vector<2x128xf32>
    %38 = arith.negf %37 : vector<2x128xf32>
    %39 = math.exp %38 : vector<2x128xf32>
    %cst_14 = arith.constant 1.000000e+00 : f32
    %40 = vector.broadcast %cst_14 : f32 to vector<2x128xf32>
    %41 = arith.addf %40, %39 : vector<2x128xf32>
    %42 = arith.divf %40, %41 : vector<2x128xf32>
    %43 = vector.extract_strided_slice %42 {offsets = [0, 0], sizes = [2, 32], strides = [1, 1]} : vector<2x128xf32> to vector<2x32xf32>
    %44 = vector.extract_strided_slice %42 {offsets = [0, 64], sizes = [2, 32], strides = [1, 1]} : vector<2x128xf32> to vector<2x32xf32>
    %cst_15 = arith.constant 2.000000e+00 : f32
    %45 = vector.broadcast %cst_15 : f32 to vector<2x32xf32>
    %46 = arith.mulf %45, %44 : vector<2x32xf32>
    %cst_16 = arith.constant 1.000000e+00 : f32
    %47 = vector.broadcast %cst_16 : f32 to vector<2x32xf32>
    %48 = arith.subf %46, %47 : vector<2x32xf32>
    %49 = vector.extract_strided_slice %42 {offsets = [0, 96], sizes = [2, 32], strides = [1, 1]} : vector<2x128xf32> to vector<2x32xf32>
    %50 = arith.mulf %43, %48 : vector<2x32xf32>
    %51 = math.tanh %50 : vector<2x32xf32>
    %52 = arith.mulf %49, %51 : vector<2x32xf32>
    %cst_17 = arith.constant dense<0.000000e+00> : vector<2x128xf32>
    %53 = tpu.matmul %52, %1, %cst_17 {dimension_numbers = #tpu.dot_dimension_numbers<[1], [0], [0], [1], [0, 0, 1, 1], [], []>} : vector<2x32xf32>, vector<32x128xf32>, vector<2x128xf32> -> vector<2x128xf32>
    %54 = vector.extract_strided_slice %15 {offsets = [0, 1, 0], sizes = [2, 1, 128], strides = [1, 1, 1]} : vector<2x8x128xf32> to vector<2x1x128xf32>
    %55 = vector.shape_cast %54 : vector<2x1x128xf32> to vector<2x128xf32>
    %56 = vector.extract_strided_slice %35 {offsets = [0, 0], sizes = [2, 128], strides = [1, 1]} : vector<2x256xf32> to vector<2x128xf32>
    %57 = arith.addf %55, %56 : vector<2x128xf32>
    %58 = arith.negf %57 : vector<2x128xf32>
    %59 = math.exp %58 : vector<2x128xf32>
    %cst_18 = arith.constant 1.000000e+00 : f32
    %60 = vector.broadcast %cst_18 : f32 to vector<2x128xf32>
    %61 = arith.addf %60, %59 : vector<2x128xf32>
    %62 = arith.divf %60, %61 : vector<2x128xf32>
    %63 = vector.extract_strided_slice %62 {offsets = [0, 0], sizes = [2, 32], strides = [1, 1]} : vector<2x128xf32> to vector<2x32xf32>
    %64 = vector.extract_strided_slice %62 {offsets = [0, 32], sizes = [2, 32], strides = [1, 1]} : vector<2x128xf32> to vector<2x32xf32>
    %65 = vector.extract_strided_slice %62 {offsets = [0, 64], sizes = [2, 32], strides = [1, 1]} : vector<2x128xf32> to vector<2x32xf32>
    %cst_19 = arith.constant 2.000000e+00 : f32
    %66 = vector.broadcast %cst_19 : f32 to vector<2x32xf32>
    %67 = arith.mulf %66, %65 : vector<2x32xf32>
    %cst_20 = arith.constant 1.000000e+00 : f32
    %68 = vector.broadcast %cst_20 : f32 to vector<2x32xf32>
    %69 = arith.subf %67, %68 : vector<2x32xf32>
    %70 = vector.extract_strided_slice %62 {offsets = [0, 96], sizes = [2, 32], strides = [1, 1]} : vector<2x128xf32> to vector<2x32xf32>
    %71 = arith.mulf %64, %32 : vector<2x32xf32>
    %72 = arith.mulf %63, %69 : vector<2x32xf32>
    %73 = arith.addf %71, %72 : vector<2x32xf32>
    %74 = math.tanh %73 : vector<2x32xf32>
    %75 = arith.mulf %70, %74 : vector<2x32xf32>
    %cst_21 = arith.constant dense<0.000000e+00> : vector<2x256xf32>
    %76 = tpu.matmul %75, %9, %cst_21 {dimension_numbers = #tpu.dot_dimension_numbers<[1], [0], [0], [1], [0, 0, 1, 1], [], []>} : vector<2x32xf32>, vector<32x256xf32>, vector<2x256xf32> -> vector<2x256xf32>
    %77 = vector.extract_strided_slice %76 {offsets = [0, 128], sizes = [2, 128], strides = [1, 1]} : vector<2x256xf32> to vector<2x128xf32>
    %78 = arith.addf %77, %53 : vector<2x128xf32>
    %79 = arith.addf %78, %17 : vector<2x128xf32>
    %80 = arith.negf %79 : vector<2x128xf32>
    %81 = math.exp %80 : vector<2x128xf32>
    %cst_22 = arith.constant 1.000000e+00 : f32
    %82 = vector.broadcast %cst_22 : f32 to vector<2x128xf32>
    %83 = arith.addf %82, %81 : vector<2x128xf32>
    %84 = arith.divf %82, %83 : vector<2x128xf32>
    %85 = vector.extract_strided_slice %84 {offsets = [0, 0], sizes = [2, 32], strides = [1, 1]} : vector<2x128xf32> to vector<2x32xf32>
    %86 = vector.extract_strided_slice %84 {offsets = [0, 32], sizes = [2, 32], strides = [1, 1]} : vector<2x128xf32> to vector<2x32xf32>
    %87 = vector.extract_strided_slice %84 {offsets = [0, 64], sizes = [2, 32], strides = [1, 1]} : vector<2x128xf32> to vector<2x32xf32>
    %cst_23 = arith.constant 2.000000e+00 : f32
    %88 = vector.broadcast %cst_23 : f32 to vector<2x32xf32>
    %89 = arith.mulf %88, %87 : vector<2x32xf32>
    %cst_24 = arith.constant 1.000000e+00 : f32
    %90 = vector.broadcast %cst_24 : f32 to vector<2x32xf32>
    %91 = arith.subf %89, %90 : vector<2x32xf32>
    %92 = vector.extract_strided_slice %84 {offsets = [0, 96], sizes = [2, 32], strides = [1, 1]} : vector<2x128xf32> to vector<2x32xf32>
    %93 = arith.mulf %86, %50 : vector<2x32xf32>
    %94 = arith.mulf %85, %91 : vector<2x32xf32>
    %95 = arith.addf %93, %94 : vector<2x32xf32>
    %96 = math.tanh %95 : vector<2x32xf32>
    %97 = arith.mulf %92, %96 : vector<2x32xf32>
    %cst_25 = arith.constant dense<0.000000e+00> : vector<2x128xf32>
    %98 = tpu.matmul %97, %1, %cst_25 {dimension_numbers = #tpu.dot_dimension_numbers<[1], [0], [0], [1], [0, 0, 1, 1], [], []>} : vector<2x32xf32>, vector<32x128xf32>, vector<2x128xf32> -> vector<2x128xf32>
    %99 = vector.extract_strided_slice %15 {offsets = [0, 2, 0], sizes = [2, 1, 128], strides = [1, 1, 1]} : vector<2x8x128xf32> to vector<2x1x128xf32>
    %100 = vector.shape_cast %99 : vector<2x1x128xf32> to vector<2x128xf32>
    %101 = vector.extract_strided_slice %76 {offsets = [0, 0], sizes = [2, 128], strides = [1, 1]} : vector<2x256xf32> to vector<2x128xf32>
    %102 = arith.addf %100, %101 : vector<2x128xf32>
    %103 = arith.negf %102 : vector<2x128xf32>
    %104 = math.exp %103 : vector<2x128xf32>
    %cst_26 = arith.constant 1.000000e+00 : f32
    %105 = vector.broadcast %cst_26 : f32 to vector<2x128xf32>
    %106 = arith.addf %105, %104 : vector<2x128xf32>
    %107 = arith.divf %105, %106 : vector<2x128xf32>
    %108 = vector.extract_strided_slice %107 {offsets = [0, 0], sizes = [2, 32], strides = [1, 1]} : vector<2x128xf32> to vector<2x32xf32>
    %109 = vector.extract_strided_slice %107 {offsets = [0, 32], sizes = [2, 32], strides = [1, 1]} : vector<2x128xf32> to vector<2x32xf32>
    %110 = vector.extract_strided_slice %107 {offsets = [0, 64], sizes = [2, 32], strides = [1, 1]} : vector<2x128xf32> to vector<2x32xf32>
    %cst_27 = arith.constant 2.000000e+00 : f32
    %111 = vector.broadcast %cst_27 : f32 to vector<2x32xf32>
    %112 = arith.mulf %111, %110 : vector<2x32xf32>
    %cst_28 = arith.constant 1.000000e+00 : f32
    %113 = vector.broadcast %cst_28 : f32 to vector<2x32xf32>
    %114 = arith.subf %112, %113 : vector<2x32xf32>
    %115 = vector.extract_strided_slice %107 {offsets = [0, 96], sizes = [2, 32], strides = [1, 1]} : vector<2x128xf32> to vector<2x32xf32>
    %116 = arith.mulf %109, %73 : vector<2x32xf32>
    %117 = arith.mulf %108, %114 : vector<2x32xf32>
    %118 = arith.addf %116, %117 : vector<2x32xf32>
    %119 = math.tanh %118 : vector<2x32xf32>
    %120 = arith.mulf %115, %119 : vector<2x32xf32>
    %cst_29 = arith.constant dense<0.000000e+00> : vector<2x256xf32>
    %121 = tpu.matmul %120, %9, %cst_29 {dimension_numbers = #tpu.dot_dimension_numbers<[1], [0], [0], [1], [0, 0, 1, 1], [], []>} : vector<2x32xf32>, vector<32x256xf32>, vector<2x256xf32> -> vector<2x256xf32>
    %122 = vector.extract_strided_slice %121 {offsets = [0, 128], sizes = [2, 128], strides = [1, 1]} : vector<2x256xf32> to vector<2x128xf32>
    %123 = arith.addf %122, %98 : vector<2x128xf32>
    %124 = arith.addf %123, %17 : vector<2x128xf32>
    %125 = arith.negf %124 : vector<2x128xf32>
    %126 = math.exp %125 : vector<2x128xf32>
    %cst_30 = arith.constant 1.000000e+00 : f32
    %127 = vector.broadcast %cst_30 : f32 to vector<2x128xf32>
    %128 = arith.addf %127, %126 : vector<2x128xf32>
    %129 = arith.divf %127, %128 : vector<2x128xf32>
    %130 = vector.extract_strided_slice %129 {offsets = [0, 0], sizes = [2, 32], strides = [1, 1]} : vector<2x128xf32> to vector<2x32xf32>
    %131 = vector.extract_strided_slice %129 {offsets = [0, 32], sizes = [2, 32], strides = [1, 1]} : vector<2x128xf32> to vector<2x32xf32>
    %132 = vector.extract_strided_slice %129 {offsets = [0, 64], sizes = [2, 32], strides = [1, 1]} : vector<2x128xf32> to vector<2x32xf32>
    %cst_31 = arith.constant 2.000000e+00 : f32
    %133 = vector.broadcast %cst_31 : f32 to vector<2x32xf32>
    %134 = arith.mulf %133, %132 : vector<2x32xf32>
    %cst_32 = arith.constant 1.000000e+00 : f32
    %135 = vector.broadcast %cst_32 : f32 to vector<2x32xf32>
    %136 = arith.subf %134, %135 : vector<2x32xf32>
    %137 = vector.extract_strided_slice %129 {offsets = [0, 96], sizes = [2, 32], strides = [1, 1]} : vector<2x128xf32> to vector<2x32xf32>
    %138 = arith.mulf %131, %95 : vector<2x32xf32>
    %139 = arith.mulf %130, %136 : vector<2x32xf32>
    %140 = arith.addf %138, %139 : vector<2x32xf32>
    %141 = math.tanh %140 : vector<2x32xf32>
    %142 = arith.mulf %137, %141 : vector<2x32xf32>
    %cst_33 = arith.constant dense<0.000000e+00> : vector<2x128xf32>
    %143 = tpu.matmul %142, %1, %cst_33 {dimension_numbers = #tpu.dot_dimension_numbers<[1], [0], [0], [1], [0, 0, 1, 1], [], []>} : vector<2x32xf32>, vector<32x128xf32>, vector<2x128xf32> -> vector<2x128xf32>
    %144 = vector.extract_strided_slice %15 {offsets = [0, 3, 0], sizes = [2, 1, 128], strides = [1, 1, 1]} : vector<2x8x128xf32> to vector<2x1x128xf32>
    %145 = vector.shape_cast %144 : vector<2x1x128xf32> to vector<2x128xf32>
    %146 = vector.extract_strided_slice %121 {offsets = [0, 0], sizes = [2, 128], strides = [1, 1]} : vector<2x256xf32> to vector<2x128xf32>
    %147 = arith.addf %145, %146 : vector<2x128xf32>
    %148 = arith.negf %147 : vector<2x128xf32>
    %149 = math.exp %148 : vector<2x128xf32>
    %cst_34 = arith.constant 1.000000e+00 : f32
    %150 = vector.broadcast %cst_34 : f32 to vector<2x128xf32>
    %151 = arith.addf %150, %149 : vector<2x128xf32>
    %152 = arith.divf %150, %151 : vector<2x128xf32>
    %153 = vector.extract_strided_slice %152 {offsets = [0, 0], sizes = [2, 32], strides = [1, 1]} : vector<2x128xf32> to vector<2x32xf32>
    %154 = vector.extract_strided_slice %152 {offsets = [0, 32], sizes = [2, 32], strides = [1, 1]} : vector<2x128xf32> to vector<2x32xf32>
    %155 = vector.extract_strided_slice %152 {offsets = [0, 64], sizes = [2, 32], strides = [1, 1]} : vector<2x128xf32> to vector<2x32xf32>
    %cst_35 = arith.constant 2.000000e+00 : f32
    %156 = vector.broadcast %cst_35 : f32 to vector<2x32xf32>
    %157 = arith.mulf %156, %155 : vector<2x32xf32>
    %cst_36 = arith.constant 1.000000e+00 : f32
    %158 = vector.broadcast %cst_36 : f32 to vector<2x32xf32>
    %159 = arith.subf %157, %158 : vector<2x32xf32>
    %160 = vector.extract_strided_slice %152 {offsets = [0, 96], sizes = [2, 32], strides = [1, 1]} : vector<2x128xf32> to vector<2x32xf32>
    %161 = arith.mulf %154, %118 : vector<2x32xf32>
    %162 = arith.mulf %153, %159 : vector<2x32xf32>
    %163 = arith.addf %161, %162 : vector<2x32xf32>
    %164 = math.tanh %163 : vector<2x32xf32>
    %165 = arith.mulf %160, %164 : vector<2x32xf32>
    %cst_37 = arith.constant dense<0.000000e+00> : vector<2x256xf32>
    %166 = tpu.matmul %165, %9, %cst_37 {dimension_numbers = #tpu.dot_dimension_numbers<[1], [0], [0], [1], [0, 0, 1, 1], [], []>} : vector<2x32xf32>, vector<32x256xf32>, vector<2x256xf32> -> vector<2x256xf32>
    %167 = vector.extract_strided_slice %166 {offsets = [0, 128], sizes = [2, 128], strides = [1, 1]} : vector<2x256xf32> to vector<2x128xf32>
    %168 = arith.addf %167, %143 : vector<2x128xf32>
    %169 = arith.addf %168, %17 : vector<2x128xf32>
    %170 = arith.negf %169 : vector<2x128xf32>
    %171 = math.exp %170 : vector<2x128xf32>
    %cst_38 = arith.constant 1.000000e+00 : f32
    %172 = vector.broadcast %cst_38 : f32 to vector<2x128xf32>
    %173 = arith.addf %172, %171 : vector<2x128xf32>
    %174 = arith.divf %172, %173 : vector<2x128xf32>
    %175 = vector.extract_strided_slice %174 {offsets = [0, 0], sizes = [2, 32], strides = [1, 1]} : vector<2x128xf32> to vector<2x32xf32>
    %176 = vector.extract_strided_slice %174 {offsets = [0, 32], sizes = [2, 32], strides = [1, 1]} : vector<2x128xf32> to vector<2x32xf32>
    %177 = vector.extract_strided_slice %174 {offsets = [0, 64], sizes = [2, 32], strides = [1, 1]} : vector<2x128xf32> to vector<2x32xf32>
    %cst_39 = arith.constant 2.000000e+00 : f32
    %178 = vector.broadcast %cst_39 : f32 to vector<2x32xf32>
    %179 = arith.mulf %178, %177 : vector<2x32xf32>
    %cst_40 = arith.constant 1.000000e+00 : f32
    %180 = vector.broadcast %cst_40 : f32 to vector<2x32xf32>
    %181 = arith.subf %179, %180 : vector<2x32xf32>
    %182 = vector.extract_strided_slice %174 {offsets = [0, 96], sizes = [2, 32], strides = [1, 1]} : vector<2x128xf32> to vector<2x32xf32>
    %183 = arith.mulf %176, %140 : vector<2x32xf32>
    %184 = arith.mulf %175, %181 : vector<2x32xf32>
    %185 = arith.addf %183, %184 : vector<2x32xf32>
    %186 = math.tanh %185 : vector<2x32xf32>
    %187 = arith.mulf %182, %186 : vector<2x32xf32>
    %cst_41 = arith.constant dense<0.000000e+00> : vector<2x128xf32>
    %188 = tpu.matmul %187, %1, %cst_41 {dimension_numbers = #tpu.dot_dimension_numbers<[1], [0], [0], [1], [0, 0, 1, 1], [], []>} : vector<2x32xf32>, vector<32x128xf32>, vector<2x128xf32> -> vector<2x128xf32>
    %189 = vector.extract_strided_slice %15 {offsets = [0, 4, 0], sizes = [2, 1, 128], strides = [1, 1, 1]} : vector<2x8x128xf32> to vector<2x1x128xf32>
    %190 = vector.shape_cast %189 : vector<2x1x128xf32> to vector<2x128xf32>
    %191 = vector.extract_strided_slice %166 {offsets = [0, 0], sizes = [2, 128], strides = [1, 1]} : vector<2x256xf32> to vector<2x128xf32>
    %192 = arith.addf %190, %191 : vector<2x128xf32>
    %193 = arith.negf %192 : vector<2x128xf32>
    %194 = math.exp %193 : vector<2x128xf32>
    %cst_42 = arith.constant 1.000000e+00 : f32
    %195 = vector.broadcast %cst_42 : f32 to vector<2x128xf32>
    %196 = arith.addf %195, %194 : vector<2x128xf32>
    %197 = arith.divf %195, %196 : vector<2x128xf32>
    %198 = vector.extract_strided_slice %197 {offsets = [0, 0], sizes = [2, 32], strides = [1, 1]} : vector<2x128xf32> to vector<2x32xf32>
    %199 = vector.extract_strided_slice %197 {offsets = [0, 32], sizes = [2, 32], strides = [1, 1]} : vector<2x128xf32> to vector<2x32xf32>
    %200 = vector.extract_strided_slice %197 {offsets = [0, 64], sizes = [2, 32], strides = [1, 1]} : vector<2x128xf32> to vector<2x32xf32>
    %cst_43 = arith.constant 2.000000e+00 : f32
    %201 = vector.broadcast %cst_43 : f32 to vector<2x32xf32>
    %202 = arith.mulf %201, %200 : vector<2x32xf32>
    %cst_44 = arith.constant 1.000000e+00 : f32
    %203 = vector.broadcast %cst_44 : f32 to vector<2x32xf32>
    %204 = arith.subf %202, %203 : vector<2x32xf32>
    %205 = vector.extract_strided_slice %197 {offsets = [0, 96], sizes = [2, 32], strides = [1, 1]} : vector<2x128xf32> to vector<2x32xf32>
    %206 = arith.mulf %199, %163 : vector<2x32xf32>
    %207 = arith.mulf %198, %204 : vector<2x32xf32>
    %208 = arith.addf %206, %207 : vector<2x32xf32>
    %209 = math.tanh %208 : vector<2x32xf32>
    %210 = arith.mulf %205, %209 : vector<2x32xf32>
    %cst_45 = arith.constant dense<0.000000e+00> : vector<2x256xf32>
    %211 = tpu.matmul %210, %9, %cst_45 {dimension_numbers = #tpu.dot_dimension_numbers<[1], [0], [0], [1], [0, 0, 1, 1], [], []>} : vector<2x32xf32>, vector<32x256xf32>, vector<2x256xf32> -> vector<2x256xf32>
    %212 = vector.extract_strided_slice %211 {offsets = [0, 128], sizes = [2, 128], strides = [1, 1]} : vector<2x256xf32> to vector<2x128xf32>
    %213 = arith.addf %212, %188 : vector<2x128xf32>
    %214 = arith.addf %213, %17 : vector<2x128xf32>
    %215 = arith.negf %214 : vector<2x128xf32>
    %216 = math.exp %215 : vector<2x128xf32>
    %cst_46 = arith.constant 1.000000e+00 : f32
    %217 = vector.broadcast %cst_46 : f32 to vector<2x128xf32>
    %218 = arith.addf %217, %216 : vector<2x128xf32>
    %219 = arith.divf %217, %218 : vector<2x128xf32>
    %220 = vector.extract_strided_slice %219 {offsets = [0, 0], sizes = [2, 32], strides = [1, 1]} : vector<2x128xf32> to vector<2x32xf32>
    %221 = vector.extract_strided_slice %219 {offsets = [0, 32], sizes = [2, 32], strides = [1, 1]} : vector<2x128xf32> to vector<2x32xf32>
    %222 = vector.extract_strided_slice %219 {offsets = [0, 64], sizes = [2, 32], strides = [1, 1]} : vector<2x128xf32> to vector<2x32xf32>
    %cst_47 = arith.constant 2.000000e+00 : f32
    %223 = vector.broadcast %cst_47 : f32 to vector<2x32xf32>
    %224 = arith.mulf %223, %222 : vector<2x32xf32>
    %cst_48 = arith.constant 1.000000e+00 : f32
    %225 = vector.broadcast %cst_48 : f32 to vector<2x32xf32>
    %226 = arith.subf %224, %225 : vector<2x32xf32>
    %227 = vector.extract_strided_slice %219 {offsets = [0, 96], sizes = [2, 32], strides = [1, 1]} : vector<2x128xf32> to vector<2x32xf32>
    %228 = arith.mulf %221, %185 : vector<2x32xf32>
    %229 = arith.mulf %220, %226 : vector<2x32xf32>
    %230 = arith.addf %228, %229 : vector<2x32xf32>
    %231 = math.tanh %230 : vector<2x32xf32>
    %232 = arith.mulf %227, %231 : vector<2x32xf32>
    %cst_49 = arith.constant dense<0.000000e+00> : vector<2x128xf32>
    %233 = tpu.matmul %232, %1, %cst_49 {dimension_numbers = #tpu.dot_dimension_numbers<[1], [0], [0], [1], [0, 0, 1, 1], [], []>} : vector<2x32xf32>, vector<32x128xf32>, vector<2x128xf32> -> vector<2x128xf32>
    %234 = vector.extract_strided_slice %15 {offsets = [0, 5, 0], sizes = [2, 1, 128], strides = [1, 1, 1]} : vector<2x8x128xf32> to vector<2x1x128xf32>
    %235 = vector.shape_cast %234 : vector<2x1x128xf32> to vector<2x128xf32>
    %236 = vector.extract_strided_slice %211 {offsets = [0, 0], sizes = [2, 128], strides = [1, 1]} : vector<2x256xf32> to vector<2x128xf32>
    %237 = arith.addf %235, %236 : vector<2x128xf32>
    %238 = arith.negf %237 : vector<2x128xf32>
    %239 = math.exp %238 : vector<2x128xf32>
    %cst_50 = arith.constant 1.000000e+00 : f32
    %240 = vector.broadcast %cst_50 : f32 to vector<2x128xf32>
    %241 = arith.addf %240, %239 : vector<2x128xf32>
    %242 = arith.divf %240, %241 : vector<2x128xf32>
    %243 = vector.extract_strided_slice %242 {offsets = [0, 0], sizes = [2, 32], strides = [1, 1]} : vector<2x128xf32> to vector<2x32xf32>
    %244 = vector.extract_strided_slice %242 {offsets = [0, 32], sizes = [2, 32], strides = [1, 1]} : vector<2x128xf32> to vector<2x32xf32>
    %245 = vector.extract_strided_slice %242 {offsets = [0, 64], sizes = [2, 32], strides = [1, 1]} : vector<2x128xf32> to vector<2x32xf32>
    %cst_51 = arith.constant 2.000000e+00 : f32
    %246 = vector.broadcast %cst_51 : f32 to vector<2x32xf32>
    %247 = arith.mulf %246, %245 : vector<2x32xf32>
    %cst_52 = arith.constant 1.000000e+00 : f32
    %248 = vector.broadcast %cst_52 : f32 to vector<2x32xf32>
    %249 = arith.subf %247, %248 : vector<2x32xf32>
    %250 = vector.extract_strided_slice %242 {offsets = [0, 96], sizes = [2, 32], strides = [1, 1]} : vector<2x128xf32> to vector<2x32xf32>
    %251 = arith.mulf %244, %208 : vector<2x32xf32>
    %252 = arith.mulf %243, %249 : vector<2x32xf32>
    %253 = arith.addf %251, %252 : vector<2x32xf32>
    %254 = math.tanh %253 : vector<2x32xf32>
    %255 = arith.mulf %250, %254 : vector<2x32xf32>
    %cst_53 = arith.constant dense<0.000000e+00> : vector<2x256xf32>
    %256 = tpu.matmul %255, %9, %cst_53 {dimension_numbers = #tpu.dot_dimension_numbers<[1], [0], [0], [1], [0, 0, 1, 1], [], []>} : vector<2x32xf32>, vector<32x256xf32>, vector<2x256xf32> -> vector<2x256xf32>
    %257 = vector.extract_strided_slice %256 {offsets = [0, 128], sizes = [2, 128], strides = [1, 1]} : vector<2x256xf32> to vector<2x128xf32>
    %258 = arith.addf %257, %233 : vector<2x128xf32>
    %259 = arith.addf %258, %17 : vector<2x128xf32>
    %260 = arith.negf %259 : vector<2x128xf32>
    %261 = math.exp %260 : vector<2x128xf32>
    %cst_54 = arith.constant 1.000000e+00 : f32
    %262 = vector.broadcast %cst_54 : f32 to vector<2x128xf32>
    %263 = arith.addf %262, %261 : vector<2x128xf32>
    %264 = arith.divf %262, %263 : vector<2x128xf32>
    %265 = vector.extract_strided_slice %264 {offsets = [0, 0], sizes = [2, 32], strides = [1, 1]} : vector<2x128xf32> to vector<2x32xf32>
    %266 = vector.extract_strided_slice %264 {offsets = [0, 32], sizes = [2, 32], strides = [1, 1]} : vector<2x128xf32> to vector<2x32xf32>
    %267 = vector.extract_strided_slice %264 {offsets = [0, 64], sizes = [2, 32], strides = [1, 1]} : vector<2x128xf32> to vector<2x32xf32>
    %cst_55 = arith.constant 2.000000e+00 : f32
    %268 = vector.broadcast %cst_55 : f32 to vector<2x32xf32>
    %269 = arith.mulf %268, %267 : vector<2x32xf32>
    %cst_56 = arith.constant 1.000000e+00 : f32
    %270 = vector.broadcast %cst_56 : f32 to vector<2x32xf32>
    %271 = arith.subf %269, %270 : vector<2x32xf32>
    %272 = vector.extract_strided_slice %264 {offsets = [0, 96], sizes = [2, 32], strides = [1, 1]} : vector<2x128xf32> to vector<2x32xf32>
    %273 = arith.mulf %266, %230 : vector<2x32xf32>
    %274 = arith.mulf %265, %271 : vector<2x32xf32>
    %275 = arith.addf %273, %274 : vector<2x32xf32>
    %276 = math.tanh %275 : vector<2x32xf32>
    %277 = arith.mulf %272, %276 : vector<2x32xf32>
    %cst_57 = arith.constant dense<0.000000e+00> : vector<2x128xf32>
    %278 = tpu.matmul %277, %1, %cst_57 {dimension_numbers = #tpu.dot_dimension_numbers<[1], [0], [0], [1], [0, 0, 1, 1], [], []>} : vector<2x32xf32>, vector<32x128xf32>, vector<2x128xf32> -> vector<2x128xf32>
    %279 = vector.extract_strided_slice %15 {offsets = [0, 6, 0], sizes = [2, 1, 128], strides = [1, 1, 1]} : vector<2x8x128xf32> to vector<2x1x128xf32>
    %280 = vector.shape_cast %279 : vector<2x1x128xf32> to vector<2x128xf32>
    %281 = vector.extract_strided_slice %256 {offsets = [0, 0], sizes = [2, 128], strides = [1, 1]} : vector<2x256xf32> to vector<2x128xf32>
    %282 = arith.addf %280, %281 : vector<2x128xf32>
    %283 = arith.negf %282 : vector<2x128xf32>
    %284 = math.exp %283 : vector<2x128xf32>
    %cst_58 = arith.constant 1.000000e+00 : f32
    %285 = vector.broadcast %cst_58 : f32 to vector<2x128xf32>
    %286 = arith.addf %285, %284 : vector<2x128xf32>
    %287 = arith.divf %285, %286 : vector<2x128xf32>
    %288 = vector.extract_strided_slice %287 {offsets = [0, 0], sizes = [2, 32], strides = [1, 1]} : vector<2x128xf32> to vector<2x32xf32>
    %289 = vector.extract_strided_slice %287 {offsets = [0, 32], sizes = [2, 32], strides = [1, 1]} : vector<2x128xf32> to vector<2x32xf32>
    %290 = vector.extract_strided_slice %287 {offsets = [0, 64], sizes = [2, 32], strides = [1, 1]} : vector<2x128xf32> to vector<2x32xf32>
    %cst_59 = arith.constant 2.000000e+00 : f32
    %291 = vector.broadcast %cst_59 : f32 to vector<2x32xf32>
    %292 = arith.mulf %291, %290 : vector<2x32xf32>
    %cst_60 = arith.constant 1.000000e+00 : f32
    %293 = vector.broadcast %cst_60 : f32 to vector<2x32xf32>
    %294 = arith.subf %292, %293 : vector<2x32xf32>
    %295 = vector.extract_strided_slice %287 {offsets = [0, 96], sizes = [2, 32], strides = [1, 1]} : vector<2x128xf32> to vector<2x32xf32>
    %296 = arith.mulf %289, %253 : vector<2x32xf32>
    %297 = arith.mulf %288, %294 : vector<2x32xf32>
    %298 = arith.addf %296, %297 : vector<2x32xf32>
    %299 = math.tanh %298 : vector<2x32xf32>
    %300 = arith.mulf %295, %299 : vector<2x32xf32>
    %cst_61 = arith.constant dense<0.000000e+00> : vector<2x256xf32>
    %301 = tpu.matmul %300, %9, %cst_61 {dimension_numbers = #tpu.dot_dimension_numbers<[1], [0], [0], [1], [0, 0, 1, 1], [], []>} : vector<2x32xf32>, vector<32x256xf32>, vector<2x256xf32> -> vector<2x256xf32>
    %302 = vector.extract_strided_slice %301 {offsets = [0, 128], sizes = [2, 128], strides = [1, 1]} : vector<2x256xf32> to vector<2x128xf32>
    %303 = arith.addf %302, %278 : vector<2x128xf32>
    %304 = arith.addf %303, %17 : vector<2x128xf32>
    %305 = arith.negf %304 : vector<2x128xf32>
    %306 = math.exp %305 : vector<2x128xf32>
    %cst_62 = arith.constant 1.000000e+00 : f32
    %307 = vector.broadcast %cst_62 : f32 to vector<2x128xf32>
    %308 = arith.addf %307, %306 : vector<2x128xf32>
    %309 = arith.divf %307, %308 : vector<2x128xf32>
    %310 = vector.extract_strided_slice %309 {offsets = [0, 0], sizes = [2, 32], strides = [1, 1]} : vector<2x128xf32> to vector<2x32xf32>
    %311 = vector.extract_strided_slice %309 {offsets = [0, 32], sizes = [2, 32], strides = [1, 1]} : vector<2x128xf32> to vector<2x32xf32>
    %312 = vector.extract_strided_slice %309 {offsets = [0, 64], sizes = [2, 32], strides = [1, 1]} : vector<2x128xf32> to vector<2x32xf32>
    %cst_63 = arith.constant 2.000000e+00 : f32
    %313 = vector.broadcast %cst_63 : f32 to vector<2x32xf32>
    %314 = arith.mulf %313, %312 : vector<2x32xf32>
    %cst_64 = arith.constant 1.000000e+00 : f32
    %315 = vector.broadcast %cst_64 : f32 to vector<2x32xf32>
    %316 = arith.subf %314, %315 : vector<2x32xf32>
    %317 = vector.extract_strided_slice %309 {offsets = [0, 96], sizes = [2, 32], strides = [1, 1]} : vector<2x128xf32> to vector<2x32xf32>
    %318 = arith.mulf %311, %275 : vector<2x32xf32>
    %319 = arith.mulf %310, %316 : vector<2x32xf32>
    %320 = arith.addf %318, %319 : vector<2x32xf32>
    %321 = math.tanh %320 : vector<2x32xf32>
    %322 = arith.mulf %317, %321 : vector<2x32xf32>
    %cst_65 = arith.constant dense<0.000000e+00> : vector<2x128xf32>
    %323 = tpu.matmul %322, %1, %cst_65 {dimension_numbers = #tpu.dot_dimension_numbers<[1], [0], [0], [1], [0, 0, 1, 1], [], []>} : vector<2x32xf32>, vector<32x128xf32>, vector<2x128xf32> -> vector<2x128xf32>
    %324 = vector.extract_strided_slice %15 {offsets = [0, 7, 0], sizes = [2, 1, 128], strides = [1, 1, 1]} : vector<2x8x128xf32> to vector<2x1x128xf32>
    %325 = vector.shape_cast %324 : vector<2x1x128xf32> to vector<2x128xf32>
    %326 = vector.extract_strided_slice %301 {offsets = [0, 0], sizes = [2, 128], strides = [1, 1]} : vector<2x256xf32> to vector<2x128xf32>
    %327 = arith.addf %325, %326 : vector<2x128xf32>
    %328 = arith.negf %327 : vector<2x128xf32>
    %329 = math.exp %328 : vector<2x128xf32>
    %cst_66 = arith.constant 1.000000e+00 : f32
    %330 = vector.broadcast %cst_66 : f32 to vector<2x128xf32>
    %331 = arith.addf %330, %329 : vector<2x128xf32>
    %332 = arith.divf %330, %331 : vector<2x128xf32>
    %333 = vector.extract_strided_slice %332 {offsets = [0, 0], sizes = [2, 32], strides = [1, 1]} : vector<2x128xf32> to vector<2x32xf32>
    %334 = vector.extract_strided_slice %332 {offsets = [0, 32], sizes = [2, 32], strides = [1, 1]} : vector<2x128xf32> to vector<2x32xf32>
    %335 = vector.extract_strided_slice %332 {offsets = [0, 64], sizes = [2, 32], strides = [1, 1]} : vector<2x128xf32> to vector<2x32xf32>
    %cst_67 = arith.constant 2.000000e+00 : f32
    %336 = vector.broadcast %cst_67 : f32 to vector<2x32xf32>
    %337 = arith.mulf %336, %335 : vector<2x32xf32>
    %cst_68 = arith.constant 1.000000e+00 : f32
    %338 = vector.broadcast %cst_68 : f32 to vector<2x32xf32>
    %339 = arith.subf %337, %338 : vector<2x32xf32>
    %340 = vector.extract_strided_slice %332 {offsets = [0, 96], sizes = [2, 32], strides = [1, 1]} : vector<2x128xf32> to vector<2x32xf32>
    %341 = arith.mulf %334, %298 : vector<2x32xf32>
    %342 = arith.mulf %333, %339 : vector<2x32xf32>
    %343 = arith.addf %341, %342 : vector<2x32xf32>
    %344 = math.tanh %343 : vector<2x32xf32>
    %345 = arith.mulf %340, %344 : vector<2x32xf32>
    %cst_69 = arith.constant dense<0.000000e+00> : vector<2x256xf32>
    %346 = tpu.matmul %345, %9, %cst_69 {dimension_numbers = #tpu.dot_dimension_numbers<[1], [0], [0], [1], [0, 0, 1, 1], [], []>} : vector<2x32xf32>, vector<32x256xf32>, vector<2x256xf32> -> vector<2x256xf32>
    %347 = vector.extract_strided_slice %346 {offsets = [0, 128], sizes = [2, 128], strides = [1, 1]} : vector<2x256xf32> to vector<2x128xf32>
    %348 = arith.addf %347, %323 : vector<2x128xf32>
    %349 = arith.addf %348, %17 : vector<2x128xf32>
    %350 = arith.negf %349 : vector<2x128xf32>
    %351 = math.exp %350 : vector<2x128xf32>
    %cst_70 = arith.constant 1.000000e+00 : f32
    %352 = vector.broadcast %cst_70 : f32 to vector<2x128xf32>
    %353 = arith.addf %352, %351 : vector<2x128xf32>
    %354 = arith.divf %352, %353 : vector<2x128xf32>
    %355 = vector.extract_strided_slice %354 {offsets = [0, 0], sizes = [2, 32], strides = [1, 1]} : vector<2x128xf32> to vector<2x32xf32>
    %356 = vector.extract_strided_slice %354 {offsets = [0, 32], sizes = [2, 32], strides = [1, 1]} : vector<2x128xf32> to vector<2x32xf32>
    %357 = vector.extract_strided_slice %354 {offsets = [0, 64], sizes = [2, 32], strides = [1, 1]} : vector<2x128xf32> to vector<2x32xf32>
    %cst_71 = arith.constant 2.000000e+00 : f32
    %358 = vector.broadcast %cst_71 : f32 to vector<2x32xf32>
    %359 = arith.mulf %358, %357 : vector<2x32xf32>
    %cst_72 = arith.constant 1.000000e+00 : f32
    %360 = vector.broadcast %cst_72 : f32 to vector<2x32xf32>
    %361 = arith.subf %359, %360 : vector<2x32xf32>
    %362 = vector.extract_strided_slice %354 {offsets = [0, 96], sizes = [2, 32], strides = [1, 1]} : vector<2x128xf32> to vector<2x32xf32>
    %363 = arith.mulf %356, %320 : vector<2x32xf32>
    %364 = arith.mulf %355, %361 : vector<2x32xf32>
    %365 = arith.addf %363, %364 : vector<2x32xf32>
    %366 = math.tanh %365 : vector<2x32xf32>
    %367 = arith.mulf %362, %366 : vector<2x32xf32>
    %cst_73 = arith.constant dense<0.000000e+00> : vector<2x128xf32>
    %368 = tpu.matmul %367, %2, %cst_73 {dimension_numbers = #tpu.dot_dimension_numbers<[1], [0], [0], [1], [0, 0, 1, 1], [], []>} : vector<2x32xf32>, vector<32x128xf32>, vector<2x128xf32> -> vector<2x128xf32>
    %369 = vector.broadcast %7 : vector<1x128xf32> to vector<2x128xf32>
    %370 = arith.addf %368, %369 : vector<2x128xf32>
    %cst_74 = arith.constant 0.000000e+00 : f32
    %371 = vector.broadcast %cst_74 : f32 to vector<2x128xf32>
    %372 = arith.maximumf %370, %371 : vector<2x128xf32>
    %cst_75 = arith.constant dense<0.000000e+00> : vector<2x128xf32>
    %373 = tpu.matmul %372, %3, %cst_75 {dimension_numbers = #tpu.dot_dimension_numbers<[1], [0], [0], [1], [0, 0, 1, 1], [], []>} : vector<2x128xf32>, vector<128x128xf32>, vector<2x128xf32> -> vector<2x128xf32>
    %374 = vector.broadcast %8 : vector<1x128xf32> to vector<2x128xf32>
    %375 = arith.addf %373, %374 : vector<2x128xf32>
    %c0_76 = arith.constant 0 : index
    %c0_77 = arith.constant 0 : index
    %376 = vector.load %arg3[%c0_76, %c0_77] : memref<2x128xf32, #tpu.memory_space<vmem>>, vector<2x128xf32>
    tpu.vector_store %arg3[%c0_76, %c0_77], %375 {strides = array<i32>} : memref<2x128xf32, #tpu.memory_space<vmem>>, vector<2x128xf32>,
    return
  }
}

</mosaic_0001>

<bundles_post_ra>
// kernel: qnet_forward_padded.1
= control target key start
LH: loop header
LB: loop body
LE: loop exit
PB: predicated region body
PF: predicated region fallthrough
CT: control target
= control target key end

     0   :  { %8 = vsyncpa [#allocation3], 0  ;;  %s3202_s0 = inlined_call_operand.hbm [shape: f32[2,8,16], index: 0, kind: input, shape index: {}]   ;;  %s3203_s1 = inlined_call_operand.hbm [shape: f32[216,128], index: 1, kind: input, shape index: {}]   ;;  %s3204_s2 = inlined_call_operand.hbm [shape: f32[32,256], index: 2, kind: input, shape index: {}]   ;;  %s3205_s3 = inlined_call_operand.hbm [shape: f32[2,128], index: 3, kind: output, shape index: {}]  }
   0x1   :  { %9 = vsyncpa [#allocation6], 0 }
   0x2   :  { %10 = vsyncpa [#allocation4], 0  ;;  %s2726_s12 = smov [#allocation5]   ;;  %s2727_s14 = smov [#allocation2]  }
   0x3   :  { %s28_s13 = sshll.u32 %s2726_s12, 4  ;;  %s16_s15 = sshll.u32 %s2727_s14, 4  ;;  %s29_s13 = int_to_ptr.vmem [resolvable:$true] %s28_s13  ;;  %s17_s15 = int_to_ptr.vmem [resolvable:$true] %s16_s15 }
   0x4   :  { %s2648_s16 = scalar_lea.vmem %s29_s13, 3456  ;;  %p2653_p1 = scmp.lt.s32.totalorder %s29_s13, %s29_s13 }
   0x5   :  { %p2649_p0 = scmp.ne.s32.totalorder %s29_s13, %s2648_s16  ;;  %p2654_p2 = scmp.lt.s32.totalorder %s2648_s16, %s2648_s16 }
   0x7   :  { %p2655_p3 = por %p2654_p2, %p2653_p1 }
   0x9   :  { %p2656_p4 = pnand %p2655_p3, %p2649_p0 }
   0xb   :  { %2659 = shalt.err (!%p2656_p4)
}
   0xc   :  { %s2728_s17 = smov 128   ;;  %s2729_s18 = smov 8  }
   0xd   :  { %34 = dma.hbm_to_vmem [thread:$0]  %s3203_s1, 3456, %s29_s13, [#allocation6], %s2728_s17, %s2728_s17, %s2729_s18  }
   0xe   :  { %s2668_s21 = scalar_lea.vmem %s17_s15, 256  ;;  %p2673_p6 = scmp.lt.s32.totalorder %s17_s15, %s17_s15 }
   0xf   :  { %p2669_p5 = scmp.ne.s32.totalorder %s17_s15, %s2668_s21  ;;  %p2674_p7 = scmp.lt.s32.totalorder %s2668_s21, %s2668_s21 }
  0x11   :  { %p2675_p8 = por %p2674_p7, %p2673_p6 }
  0x13   :  { %p2676_p9 = pnand %p2675_p8, %p2669_p5 }
  0x15   :  { %2679 = shalt.err (!%p2676_p9)
}
  0x16   :  { %22 = dma.hbm_to_vmem [thread:$0]  %s3202_s0, 256, %s17_s15, [#allocation3], %s2728_s17, %s2728_s17, %s2729_s18  }
  0x17   :  { %s2730_s24 = smov [#allocation7]  }
  0x18   :  { %s40_s25 = sshll.u32 %s2730_s24, 4  ;;  %s41_s25 = int_to_ptr.vmem [resolvable:$true] %s40_s25 }
  0x19   :  { %s2688_s26 = scalar_lea.vmem %s41_s25, 1024  ;;  %p2693_p11 = scmp.lt.s32.totalorder %s41_s25, %s41_s25 }
  0x1a   :  { %p2689_p10 = scmp.ne.s32.totalorder %s41_s25, %s2688_s26  ;;  %p2694_p12 = scmp.lt.s32.totalorder %s2688_s26, %s2688_s26 }
  0x1c   :  { %p2695_p13 = por %p2694_p12, %p2693_p11 }
  0x1e   :  { %p2696_p0 = pnand %p2695_p13, %p2689_p10 }
  0x20   :  { %2699 = shalt.err (!%p2696_p0)
}
  0x21   :  { %s2731_s1 = smov 256   ;;  %s2732_s27 = smov 16  }
  0x22   :  { %46 = dma.hbm_to_vmem [thread:$0]  %s3204_s2, 1024, %s41_s25, [#allocation6], %s2731_s1, %s2731_s1, %s2732_s27  }
  0x23   :  { %2720 = dma.done.wait [#allocation3], 256  }
  0x24   :  { %2721 = vsyncadd [#allocation3], 4294967040 }
  0x25   :  { %2722 = dma.done.wait [#allocation6], 4480  }
  0x26   :  { %2723 = vsyncadd [#allocation6], 4294962816  ;;  %vm97_vm0 = vcmask 130048   ;;  %v57_v0 = vld [vmem:[#allocation5 + $0x8] sm:$0xff]  ;;  %v56_v1 = vld [vmem:[#allocation5] sm:$0xff]  ;;  %v93_v4 = vlaneseq  ;;  %s2733_s0 = smov 64  }
  0x27   :  { %v91_v2 = vld [vmem:[#allocation2] sm:$0xff]  ;;  %2340 = vmatprep.subr.mxu0 %v57_v0  ;;  %v92_v3 = vld [vmem:[#allocation2 + $0x8] sm:$0xff]  ;;  %v2790_v30 = vld [vmem:[#allocation7 + $0x30] sm:$0xff]  ;;  %v2734_v33 = vmov 0.0   ;;  %s2735_s2 = smov 96   ;;  %vm224_vm1 = vcmask 1041409  }
  0x28   :  { %2344 = vmatprep.mubr.msk.f32.mxu0 %vm97_vm0, %v91_v2  ;;  %2341 = vmatpush3.msra.mxu0 %v57_v0  ;;  %v2768_v5 = vshrl.u32 %v93_v4, 7  ;;  %v2771_v7 = vld [vmem:[#allocation5 + $0xd0] sm:$0xff]  ;;  %v2792_v31 = vld [vmem:[#allocation7 + $0x28] sm:$0xff]  ;;  %v2795_v32 = vld [vmem:[#allocation7 + $0x20] sm:$0xff]  ;;  %s2736_s30 = smov 32   ;;  %vm228_vm2 = vcmask 261120  }
  0x29   :  { %2342 = vmatprep.subr.mxu0 %v56_v1  ;;  %v2788_v29 = vld [vmem:[#allocation7 + $0x38] sm:$0xff]  ;;  %v2803_v35 = vld [vmem:[#allocation7 + $0x10] sm:$0xff]  ;;  %v2807_v36 = vld [vmem:[#allocation7 + $0x8] sm:$0xff]  ;;  %784 = vmatprep.mubr.f32.mxu1 %v2734_v33  ;;  %vm2737_vm3 = vmmov 0   ;;  %s2738_s4 = smov [#allocation8]  }
  0x2a   :  { %2343 = vmatpush3.msra.mxu0 %v56_v1  ;;  %v95_v6 = vsub.s32 0, %v2768_v5  ;;  %v2799_v34 = vld [vmem:[#allocation7 + $0x18] sm:$0xff]  ;;  %744 = vmatprep.subr.mxu1 %v2788_v29  ;;  %v2811_v38 = vld [vmem:[#allocation7] sm:$0xff]  ;;  %v181_v47 = vsub.s32 1, %v2768_v5  ;;  %s2203_s5 = sshll.u32 %s2738_s4, 4  ;;  %s2204_s5 = int_to_ptr.vmem [resolvable:$true] %s2203_s5 }
  0x2b   :  { %2345 = vmatmul.mubr.msk.f32.vlgmr.msra.gmra.mxu0 %vm97_vm0, %v92_v3  ;;  %255 = vmatprep.subr.mxu0 %v2788_v29  ;;  %s2700_s6 = scalar_lea.vmem %s2204_s5, 32  ;;  %p2705_p2 = scmp.lt.s32.totalorder %s2204_s5, %s2204_s5 }
  0x2c   :  { %v96_v8 = vrot.slane %v2771_v7, %v95_v6  ;;  %295 = vmatprep.mubr.f32.mxu0 %v2734_v33  ;;  %256 = vmatpush1.msra.mxu0 %v2790_v30  ;;  %v2831_v48 = vrot.slane %v2771_v7, %v181_v47  ;;  %p2701_p1 = scmp.ne.s32.totalorder %s2204_s5, %s2700_s6  ;;  %p2706_p3 = scmp.lt.s32.totalorder %s2700_s6, %s2700_s6 }
  0x2d   :  { %257 = vmatprep.subr.mxu0 %v2792_v31  ;;  %745 = vmatpush1.msra.mxu1 %v2790_v30 }
  0x2e   :  { %258 = vmatpush1.msra.mxu0 %v2795_v32  ;;  %746 = vmatprep.subr.mxu1 %v2792_v31  ;;  %p2707_p4 = por %p2706_p3, %p2705_p2 }
  0x2f   :  { %259 = vmatprep.subr.mxu0 %v2799_v34  ;;  %747 = vmatpush1.msra.mxu1 %v2795_v32 }
  0x30   :  { %260 = vmatpush1.msra.mxu0 %v2803_v35  ;;  %748 = vmatprep.subr.mxu1 %v2799_v34  ;;  %p2708_p5 = pnand %p2707_p4, %p2701_p1 }
  0x31   :  { %261 = vmatprep.subr.mxu0 %v2807_v36  ;;  %749 = vmatpush1.msra.mxu1 %v2803_v35 }
  0x32   :  { %262 = vmatpush1.msra.mxu0 %v2811_v38  ;;  %750 = vmatprep.subr.mxu1 %v2807_v36 }
  0x33   :  { %2347 = vmatprep.subr.mxu0 %v2734_v33  ;;  %751 = vmatpush1.msra.mxu1 %v2811_v38 }
  0x34   :  { %989 = vmatprep.subr.mxu1 %v2788_v29 }
  0xeb   :  { %v2346_v9 = vpop.f32.mrf.mxu0 }
  0xec   :  { %v2774_v10 = vadd.f32 %v2346_v9, %v96_v8 }
  0xed   :  { %v170_v11 = vpop.f32.mrf.mxu0 }
  0xee   :  { %v2216_v12 = vmul.f32 -1.442695, %v2774_v10  ;;  %v2777_v13 = vadd.f32 %v170_v11, %v96_v8 }
  0xf0   :  { %2483 = vpow2.f32 %v2216_v12  ;;  %v2215_v14 = vmul.f32 -1.442695, %v2777_v13 }
  0xf2   :  { %2485 = vpow2.f32 %v2215_v14 }
  0xfd   :  { %v2484_v15 = vpop.eup %2483 }
  0xfe   :  { %v190_v16 = vadd.f32 1.0, %v2484_v15 }
  0xff   :  { %v2486_v17 = vpop.eup %2485 }
 0x100   :  { %2487 = vrcp.f32 %v190_v16  ;;  %v189_v18 = vadd.f32 1.0, %v2486_v17 }
 0x102   :  { %2489 = vrcp.f32 %v189_v18 }
 0x10d   :  { %v2488_v19 = vpop.eup %2487 }
 0x10e   :  { %v196_v20 = vmul.f32 2.0, %v2488_v19 }
 0x10f   :  { %v2490_v21 = vpop.eup %2489 }
 0x110   :  { %v2218_v22 = vadd.f32 -1.0, %v196_v20  ;;  %v195_v23 = vmul.f32 2.0, %v2490_v21  ;;  %v2848_v20 = vld [vmem:[#allocation5 + $0x28] sm:$0xff] }
 0x112   :  { %203 = vrot.lane.b32.xlu0 %v2218_v22, %s2733_s0  ;;  %v2217_v24 = vadd.f32 -1.0, %v195_v23 }
 0x116   :  { %201 = vrot.lane.b32.xlu0 %v2217_v24, %s2733_s0 }
 0x184   :  { %v204_v25 = vpop.permute.xlu0 %203 }
 0x185   :  { %v2782_v26 = vmul.f32 %v2488_v19, %v204_v25 }
 0x187   :  { %2491 = vtanh.f32 %v2782_v26  ;;  %v422_v12 = vrot.slane %v2782_v26, 7 }
 0x188   :  { %v202_v27 = vpop.permute.xlu0 %201 }
 0x189   :  { %v2785_v28 = vmul.f32 %v2490_v21, %v202_v27 }
 0x18b   :  { %2493 = vtanh.f32 %v2785_v28  ;;  %v421_v9 = vrot.slane %v2785_v28, 7 }
 0x194   :  { %v2492_v37 = vpop.eup %2491 }
 0x195   :  { %215 = vrot.lane.b32.xlu1 %v2492_v37, %s2735_s2 }
 0x198   :  { %v2494_v39 = vpop.eup %2493 }
 0x199   :  { %213 = vrot.lane.b32.xlu1 %v2494_v39, %s2735_s2  ;;  %v2858_v39 = vld [vmem:[#allocation5 + $0x20] sm:$0xff] }
 0x207   :  { %v216_v40 = vpop.permute.xlu1 %215 }
 0x208   :  { %v220_v41 = vmul.f32 %v2488_v19, %v216_v40  ;;  %v2863_v40 = vld [vmem:[#allocation5 + $0x18] sm:$0xff] }
 0x20a   :  { %v223_v43 = vrot.slane %v220_v41, 7  ;;  %v2866_v41 = vld [vmem:[#allocation5 + $0x10] sm:$0xff] }
 0x20b   :  { %v214_v42 = vpop.permute.xlu1 %213 }
 0x20c   :  { %v219_v44 = vmul.f32 %v2490_v21, %v214_v42 }
 0x20e   :  { %v225_v45 = vsel %vm224_vm1, %v223_v43, %v219_v44 }
 0x20f   :  { %226 = vrot.lane.b32.xlu0 %v225_v45, %s2736_s30 }
 0x281   :  { %v227_v46 = vpop.permute.xlu0 %226 }
 0x282   :  { %2219 = vmatmul.mubr.msk.f32.vlgmr.msra.gmra.mxu0 %vm228_vm2, %v227_v46 }
 0x283   :  { %2348 = vmatpush3.msra.mxu0 %v2848_v20  ;;  %2355 = vmatprep.mubr.msk.f32.mxu0 %vm2737_vm3, %v2734_v33 }
 0x284   :  { %2349 = vmatprep.subr.mxu0 %v2734_v33 }
 0x285   :  { %2350 = vmatpush3.msra.mxu0 %v2858_v39 }
 0x286   :  { %2351 = vmatprep.subr.mxu0 %v2734_v33 }
 0x287   :  { %2352 = vmatpush3.msra.mxu0 %v2863_v40 }
 0x288   :  { %2353 = vmatprep.subr.mxu0 %v2734_v33 }
 0x289   :  { %2354 = vmatpush3.msra.mxu0 %v2866_v41 }
 0x28a   :  { %495 = vmatprep.subr.mxu0 %v2788_v29 }
 0x342   :  { %v297_v49 = vpop.f32.mrf.mxu0 }
 0x343   :  { %v398_v50 = vrot.slane %v297_v49, 7  ;;  %v402_v51 = vadd.f32 %v297_v49, %v2774_v10 }
 0x344   :  { %v299_v52 = vpop.f32.mrf.mxu0 }
 0x345   :  { %v401_v53 = vadd.f32 %v398_v50, %v2777_v13  ;;  %v2224_v54 = vmul.f32 -1.442695, %v402_v51  ;;  %v302_v55 = vadd.f32 %v299_v52, %v2831_v48 }
 0x347   :  { %v2223_v56 = vmul.f32 -1.442695, %v401_v53  ;;  %2495 = vpow2.f32 %v2224_v54  ;;  %v2220_v57 = vmul.f32 -1.442695, %v302_v55 }
 0x349   :  { %2497 = vpow2.f32 %v2223_v56 }
 0x34a   :  { %2499 = vpow2.f32 %v2220_v57 }
 0x354   :  { %v2496_v58 = vpop.eup %2495 }
 0x355   :  { %v410_v59 = vadd.f32 1.0, %v2496_v58 }
 0x356   :  { %v2498_v60 = vpop.eup %2497 }
 0x357   :  { %v2500_v61 = vpop.eup %2499  ;;  %v409_v62 = vadd.f32 1.0, %v2498_v60  ;;  %2501 = vrcp.f32 %v410_v59 }
 0x358   :  { %v306_v63 = vadd.f32 1.0, %v2500_v61 }
 0x359   :  { %2503 = vrcp.f32 %v409_v62 }
 0x35a   :  { %2505 = vrcp.f32 %v306_v63 }
 0x364   :  { %v2502_v0 = vpop.eup %2501 }
 0x365   :  { %v416_v1 = vmul.f32 2.0, %v2502_v0 }
 0x366   :  { %v2504_v2 = vpop.eup %2503 }
 0x367   :  { %v2506_v3 = vpop.eup %2505  ;;  %v2226_v4 = vadd.f32 -1.0, %v416_v1  ;;  %v415_v6 = vmul.f32 2.0, %v2504_v2 }
 0x368   :  { %v309_v8 = vmul.f32 2.0, %v2506_v3 }
 0x369   :  { %435 = vrot.lane.b32.xlu0 %v2226_v4, %s2733_s0  ;;  %v2225_v7 = vadd.f32 -1.0, %v415_v6 }
 0x36a   :  { %v2221_v11 = vadd.f32 -1.0, %v309_v8 }
 0x36b   :  { %433 = vrot.lane.b32.xlu1 %v2225_v7, %s2733_s0 }
 0x36d   :  { %423 = vrot.lane.b32.xlu0 %v421_v9, %s2736_s30 }
 0x36f   :  { %312 = vrot.lane.b32.xlu1 %v2221_v11, %s2733_s0 }
 0x373   :  { %425 = vrot.lane.b32.xlu1 %v422_v12, %s2736_s30 }
 0x3db   :  { %v436_v14 = vpop.permute.xlu0 %435 }
 0x3dc   :  { %v440_v15 = vmul.f32 %v2502_v0, %v436_v14 }
 0x3dd   :  { %v434_v16 = vpop.permute.xlu1 %433 }
 0x3de   :  { %v439_v17 = vmul.f32 %v2504_v2, %v434_v16  ;;  %445 = vrot.lane.b32.xlu1 %v440_v15, %s2736_s30 }
 0x3df   :  { %v424_v23 = vpop.permute.xlu0 %423 }
 0x3e0   :  { %443 = vrot.lane.b32.xlu0 %v439_v17, %s2736_s30  ;;  %v429_v26 = vmul.f32 %v2504_v2, %v424_v23 }
 0x3e1   :  { %v313_v18 = vpop.permute.xlu1 %312 }
 0x3e2   :  { %v2845_v19 = vmul.f32 %v2506_v3, %v313_v18 }
 0x3e4   :  { %2507 = vtanh.f32 %v2845_v19 }
 0x3e5   :  { %v426_v22 = vpop.permute.xlu1 %425 }
 0x3e6   :  { %v430_v24 = vmul.f32 %v2502_v0, %v426_v22 }
 0x3f1   :  { %v2508_v21 = vpop.eup %2507 }
 0x3f2   :  { %318 = vrot.lane.b32.xlu0 %v2508_v21, %s2735_s2 }
 0x450   :  { %v446_v25 = vpop.permute.xlu1 %445 }
 0x451   :  { %v2853_v27 = vadd.f32 %v446_v25, %v430_v24 }
 0x452   :  { %v444_v28 = vpop.permute.xlu0 %443 }
 0x453   :  { %2509 = vtanh.f32 %v2853_v27  ;;  %v2856_v37 = vadd.f32 %v444_v28, %v429_v26 }
 0x455   :  { %2511 = vtanh.f32 %v2856_v37 }
 0x460   :  { %v2510_v42 = vpop.eup %2509 }
 0x461   :  { %457 = vrot.lane.b32.xlu0 %v2510_v42, %s2733_s0 }
 0x462   :  { %v2512_v43 = vpop.eup %2511 }
 0x463   :  { %455 = vrot.lane.b32.xlu1 %v2512_v43, %s2733_s0 }
 0x464   :  { %v319_v44 = vpop.permute.xlu0 %318 }
 0x465   :  { %v321_v45 = vmul.f32 %v2506_v3, %v319_v44  ;;  %v673_v44 = vrot.slane %v2856_v37, 7 }
 0x467   :  { %323 = vrot.lane.b32.xlu1 %v321_v45, %s2736_s30  ;;  %v674_v45 = vrot.slane %v2853_v27, 7 }
 0x4d3   :  { %v458_v46 = vpop.permute.xlu0 %457 }
 0x4d4   :  { %v462_v50 = vmul.f32 %v2502_v0, %v458_v46 }
 0x4d5   :  { %v456_v47 = vpop.permute.xlu1 %455 }
 0x4d6   :  { %v461_v49 = vmul.f32 %v2504_v2, %v456_v47 }
 0x4d8   :  { %v465_v51 = vrot.slane %v461_v49, 1 }
 0x4d9   :  { %v324_v52 = vpop.permute.xlu1 %323 }
 0x4da   :  { %2356 = vmatmul.mubr.msk.f32.vlgmr.msra.gmra.mxu0 %vm228_vm2, %v324_v52  ;;  %v466_v53 = vsel %vm224_vm1, %v462_v50, %v465_v51 }
 0x4db   :  { %467 = vrot.lane.b32.xlu0 %v466_v53, %s2736_s30  ;;  %496 = vmatpush1.msra.mxu0 %v2790_v30 }
 0x4dc   :  { %497 = vmatprep.subr.mxu0 %v2792_v31  ;;  %535 = vmatprep.mubr.f32.mxu0 %v2734_v33 }
 0x4dd   :  { %498 = vmatpush1.msra.mxu0 %v2795_v32 }
 0x4de   :  { %499 = vmatprep.subr.mxu0 %v2799_v34 }
 0x4df   :  { %500 = vmatpush1.msra.mxu0 %v2803_v35 }
 0x4e0   :  { %501 = vmatprep.subr.mxu0 %v2807_v36 }
 0x4e1   :  { %502 = vmatpush1.msra.mxu0 %v2811_v38 }
 0x4e2   :  { %2358 = vmatprep.subr.mxu0 %v2734_v33 }
 0x54d   :  { %v468_v54 = vpop.permute.xlu0 %467 }
 0x54e   :  { %2227 = vmatmul.mubr.msk.f32.vlgmr.msra.gmra.mxu0 %vm228_vm2, %v468_v54 }
 0x54f   :  { %2359 = vmatpush3.msra.mxu0 %v2848_v20  ;;  %2366 = vmatprep.mubr.msk.f32.mxu0 %vm2737_vm3, %v2734_v33 }
 0x550   :  { %2360 = vmatprep.subr.mxu0 %v2734_v33 }
 0x551   :  { %2361 = vmatpush3.msra.mxu0 %v2858_v39 }
 0x552   :  { %2362 = vmatprep.subr.mxu0 %v2734_v33 }
 0x553   :  { %2363 = vmatpush3.msra.mxu0 %v2863_v40 }
 0x554   :  { %2364 = vmatprep.subr.mxu0 %v2734_v33 }
 0x555   :  { %2365 = vmatpush3.msra.mxu0 %v2866_v41 }
 0x556   :  { %2369 = vmatprep.subr.mxu0 %v2734_v33 }
 0x59a   :  { %v393_v55 = vpop.f32.mrf.mxu0 }
 0x59c   :  { %v2357_v56 = vpop.f32.mrf.mxu0 }
 0x60e   :  { %v537_v57 = vpop.f32.mrf.mxu0 }
 0x60f   :  { %v649_v58 = vrot.slane %v537_v57, 6  ;;  %v650_v59 = vrot.slane %v537_v57, 7 }
 0x610   :  { %v539_v60 = vpop.f32.mrf.mxu0 }
 0x611   :  { %v653_v61 = vadd.f32 %v649_v58, %v2777_v13  ;;  %v654_v62 = vadd.f32 %v650_v59, %v2774_v10  ;;  %v542_v63 = vadd.f32 %v539_v60, %v393_v55 }
 0x613   :  { %v2231_v0 = vmul.f32 -1.442695, %v653_v61  ;;  %v2232_v1 = vmul.f32 -1.442695, %v654_v62  ;;  %v543_v2 = vadd.f32 %v542_v63, %v2831_v48 }
 0x615   :  { %2513 = vpow2.f32 %v2231_v0  ;;  %v2228_v3 = vmul.f32 -1.442695, %v543_v2 }
 0x616   :  { %2515 = vpow2.f32 %v2232_v1 }
 0x617   :  { %2517 = vpow2.f32 %v2228_v3 }
 0x622   :  { %v2514_v4 = vpop.eup %2513 }
 0x623   :  { %v2516_v6 = vpop.eup %2515  ;;  %v661_v7 = vadd.f32 1.0, %v2514_v4 }
 0x624   :  { %v2518_v8 = vpop.eup %2517  ;;  %v662_v9 = vadd.f32 1.0, %v2516_v6 }
 0x625   :  { %2519 = vrcp.f32 %v661_v7  ;;  %v547_v11 = vadd.f32 1.0, %v2518_v8 }
 0x626   :  { %2521 = vrcp.f32 %v662_v9 }
 0x627   :  { %2523 = vrcp.f32 %v547_v11 }
 0x632   :  { %v2520_v12 = vpop.eup %2519 }
 0x633   :  { %v2522_v14 = vpop.eup %2521  ;;  %v667_v15 = vmul.f32 2.0, %v2520_v12  ;;  %v677_v46 = vmul.f32 %v2520_v12, %v673_v44 }
 0x634   :  { %v2524_v16 = vpop.eup %2523  ;;  %v668_v17 = vmul.f32 2.0, %v2522_v14  ;;  %v678_v49 = vmul.f32 %v2522_v14, %v674_v45 }
 0x635   :  { %v2233_v18 = vadd.f32 -1.0, %v667_v15  ;;  %v550_v21 = vmul.f32 2.0, %v2524_v16 }
 0x636   :  { %v2234_v22 = vadd.f32 -1.0, %v668_v17 }
 0x637   :  { %681 = vrot.lane.b32.xlu1 %v2233_v18, %s2733_s0  ;;  %v2229_v23 = vadd.f32 -1.0, %v550_v21 }
 0x638   :  { %683 = vrot.lane.b32.xlu0 %v2234_v22, %s2733_s0 }
 0x63b   :  { %558 = vrot.lane.b32.xlu1 %v2229_v23, %s2733_s0 }
 0x6a9   :  { %v682_v24 = vpop.permute.xlu1 %681 }
 0x6aa   :  { %v684_v25 = vpop.permute.xlu0 %683  ;;  %v687_v26 = vmul.f32 %v2520_v12, %v682_v24 }
 0x6ab   :  { %v688_v28 = vmul.f32 %v2522_v14, %v684_v25 }
 0x6ac   :  { %691 = vrot.lane.b32.xlu0 %v687_v26, %s2736_s30 }
 0x6ad   :  { %693 = vrot.lane.b32.xlu1 %v688_v28, %s2736_s30  ;;  %v559_v42 = vpop.permute.xlu1 %558 }
 0x6ae   :  { %v561_v43 = vmul.f32 %v2524_v16, %v559_v42 }
 0x6b0   :  { %553 = vrot.lane.b32.xlu0 %v2845_v19, %s2736_s30 }
 0x6b1   :  { %563 = vrot.lane.b32.xlu1 %v561_v43, %s2736_s30 }
 0x71e   :  { %v692_v47 = vpop.permute.xlu0 %691 }
 0x71f   :  { %v2912_v50 = vadd.f32 %v692_v47, %v677_v46  ;;  %v694_v51 = vpop.permute.xlu1 %693 }
 0x720   :  { %v2914_v52 = vadd.f32 %v694_v51, %v678_v49 }
 0x721   :  { %2525 = vtanh.f32 %v2912_v50 }
 0x722   :  { %2527 = vtanh.f32 %v2914_v52  ;;  %v554_v53 = vpop.permute.xlu0 %553 }
 0x723   :  { %v556_v19 = vmul.f32 %v2524_v16, %v554_v53  ;;  %v564_v54 = vpop.permute.xlu1 %563 }
 0x725   :  { %v2918_v55 = vadd.f32 %v564_v54, %v556_v19 }
 0x727   :  { %2529 = vtanh.f32 %v2918_v55 }
 0x72e   :  { %v2526_v27 = vpop.eup %2525 }
 0x72f   :  { %v2528_v37 = vpop.eup %2527  ;;  %703 = vrot.lane.b32.xlu0 %v2526_v27, %s2733_s0 }
 0x730   :  { %705 = vrot.lane.b32.xlu1 %v2528_v37, %s2733_s0 }
 0x734   :  { %v2530_v56 = vpop.eup %2529 }
 0x735   :  { %569 = vrot.lane.b32.xlu0 %v2530_v56, %s2733_s0 }
 0x7a1   :  { %v704_v57 = vpop.permute.xlu0 %703 }
 0x7a2   :  { %v709_v58 = vmul.f32 %v2520_v12, %v704_v57  ;;  %v706_v59 = vpop.permute.xlu1 %705 }
 0x7a3   :  { %v710_v60 = vmul.f32 %v2522_v14, %v706_v59  ;;  %v919_v59 = vrot.slane %v2914_v52, 7 }
 0x7a4   :  { %v713_v61 = vrot.slane %v709_v58, 2  ;;  %v918_v58 = vrot.slane %v2912_v50, 7 }
 0x7a5   :  { %v714_v62 = vrot.slane %v710_v60, 1 }
 0x7a7   :  { %v570_v63 = vpop.permute.xlu0 %569  ;;  %v715_v0 = vsel %vm224_vm1, %v714_v62, %v713_v61 }
 0x7a8   :  { %v572_v1 = vmul.f32 %v2524_v16, %v570_v63  ;;  %716 = vrot.lane.b32.xlu1 %v715_v0, %s2736_s30 }
 0x7aa   :  { %574 = vrot.lane.b32.xlu0 %v572_v1, %s2736_s30 }
 0x81a   :  { %v717_v2 = vpop.permute.xlu1 %716 }
 0x81b   :  { %2235 = vmatmul.mubr.msk.f32.vlgmr.msra.gmra.mxu1 %vm228_vm2, %v717_v2 }
 0x81c   :  { %v575_v3 = vpop.permute.xlu0 %574  ;;  %990 = vmatpush1.msra.mxu1 %v2790_v30  ;;  %1029 = vmatprep.mubr.f32.mxu1 %v2734_v33 }
 0x81d   :  { %2367 = vmatmul.mubr.msk.f32.vlgmr.msra.gmra.mxu0 %vm228_vm2, %v575_v3  ;;  %991 = vmatprep.subr.mxu1 %v2792_v31 }
 0x81e   :  { %2370 = vmatpush3.msra.mxu0 %v2848_v20  ;;  %992 = vmatpush1.msra.mxu1 %v2795_v32 }
 0x81f   :  { %2371 = vmatprep.subr.mxu0 %v2734_v33  ;;  %993 = vmatprep.subr.mxu1 %v2799_v34 }
 0x820   :  { %2372 = vmatpush3.msra.mxu0 %v2858_v39  ;;  %994 = vmatpush1.msra.mxu1 %v2803_v35 }
 0x821   :  { %2373 = vmatprep.subr.mxu0 %v2734_v33  ;;  %995 = vmatprep.subr.mxu1 %v2807_v36 }
 0x822   :  { %2374 = vmatpush3.msra.mxu0 %v2863_v40  ;;  %996 = vmatpush1.msra.mxu1 %v2811_v38 }
 0x823   :  { %2375 = vmatprep.subr.mxu0 %v2734_v33  ;;  %2377 = vmatprep.mubr.msk.f32.mxu0 %vm2737_vm3, %v2734_v33 }
 0x824   :  { %2376 = vmatpush3.msra.mxu0 %v2866_v41  ;;  %1234 = vmatprep.subr.mxu1 %v2788_v29 }
 0x825   :  { %2380 = vmatprep.subr.mxu0 %v2734_v33 }
 0x8db   :  { %v786_v4 = vpop.f32.mrf.mxu1 }
 0x8dc   :  { %v894_v6 = vrot.slane %v786_v4, 5  ;;  %v895_v7 = vrot.slane %v786_v4, 6 }
 0x8dd   :  { %v788_v8 = vpop.f32.mrf.mxu1  ;;  %v644_v9 = vpop.f32.mrf.mxu0 }
 0x8de   :  { %v898_v11 = vadd.f32 %v894_v6, %v2777_v13  ;;  %v899_v12 = vadd.f32 %v895_v7, %v2774_v10  ;;  %v791_v14 = vadd.f32 %v788_v8, %v644_v9 }
 0x8df   :  { %v2368_v15 = vpop.f32.mrf.mxu0 }
 0x8e0   :  { %v2239_v16 = vmul.f32 -1.442695, %v898_v11  ;;  %v2240_v17 = vmul.f32 -1.442695, %v899_v12  ;;  %v792_v18 = vadd.f32 %v791_v14, %v2831_v48 }
 0x8e2   :  { %2531 = vpow2.f32 %v2239_v16  ;;  %v2236_v21 = vmul.f32 -1.442695, %v792_v18 }
 0x8e3   :  { %2533 = vpow2.f32 %v2240_v17 }
 0x8e4   :  { %2535 = vpow2.f32 %v2236_v21 }
 0x8ef   :  { %v2532_v22 = vpop.eup %2531 }
 0x8f0   :  { %v2534_v23 = vpop.eup %2533  ;;  %v906_v24 = vadd.f32 1.0, %v2532_v22 }
 0x8f1   :  { %v2536_v25 = vpop.eup %2535  ;;  %v907_v26 = vadd.f32 1.0, %v2534_v23 }
 0x8f2   :  { %2537 = vrcp.f32 %v906_v24  ;;  %v796_v28 = vadd.f32 1.0, %v2536_v25 }
 0x8f3   :  { %2539 = vrcp.f32 %v907_v26 }
 0x8f4   :  { %2541 = vrcp.f32 %v796_v28 }
 0x8ff   :  { %v2538_v42 = vpop.eup %2537 }
 0x900   :  { %v2540_v43 = vpop.eup %2539  ;;  %v912_v44 = vmul.f32 2.0, %v2538_v42  ;;  %v922_v60 = vmul.f32 %v2538_v42, %v918_v58 }
 0x901   :  { %v2542_v45 = vpop.eup %2541  ;;  %v913_v46 = vmul.f32 2.0, %v2540_v43  ;;  %v923_v62 = vmul.f32 %v2540_v43, %v919_v59 }
 0x902   :  { %v2241_v47 = vadd.f32 -1.0, %v912_v44  ;;  %v799_v49 = vmul.f32 2.0, %v2542_v45  ;;  %v801_v2 = vmul.f32 %v2542_v45, %v2918_v55 }
 0x903   :  { %v2242_v51 = vadd.f32 -1.0, %v913_v46 }
 0x904   :  { %926 = vrot.lane.b32.xlu1 %v2241_v47, %s2733_s0  ;;  %v2237_v53 = vadd.f32 -1.0, %v799_v49 }
 0x905   :  { %928 = vrot.lane.b32.xlu0 %v2242_v51, %s2733_s0 }
 0x908   :  { %803 = vrot.lane.b32.xlu1 %v2237_v53, %s2733_s0 }
 0x976   :  { %v927_v19 = vpop.permute.xlu1 %926 }
 0x977   :  { %v929_v54 = vpop.permute.xlu0 %928  ;;  %v932_v27 = vmul.f32 %v2538_v42, %v927_v19 }
 0x978   :  { %v933_v37 = vmul.f32 %v2540_v43, %v929_v54 }
 0x979   :  { %936 = vrot.lane.b32.xlu0 %v932_v27, %s2736_s30 }
 0x97a   :  { %938 = vrot.lane.b32.xlu1 %v933_v37, %s2736_s30  ;;  %v804_v56 = vpop.permute.xlu1 %803 }
 0x97b   :  { %v806_v57 = vmul.f32 %v2542_v45, %v804_v56 }
 0x97d   :  { %808 = vrot.lane.b32.xlu0 %v806_v57, %s2736_s30 }
 0x9eb   :  { %v937_v61 = vpop.permute.xlu0 %936 }
 0x9ec   :  { %v2959_v63 = vadd.f32 %v937_v61, %v922_v60  ;;  %v939_v0 = vpop.permute.xlu1 %938 }
 0x9ed   :  { %v2961_v1 = vadd.f32 %v939_v0, %v923_v62 }
 0x9ee   :  { %2543 = vtanh.f32 %v2959_v63 }
 0x9ef   :  { %2545 = vtanh.f32 %v2961_v1  ;;  %v809_v3 = vpop.permute.xlu0 %808 }
 0x9f0   :  { %v2966_v4 = vadd.f32 %v809_v3, %v801_v2 }
 0x9f2   :  { %2547 = vtanh.f32 %v2966_v4 }
 0x9fb   :  { %v2544_v50 = vpop.eup %2543 }
 0x9fc   :  { %v2546_v52 = vpop.eup %2545  ;;  %948 = vrot.lane.b32.xlu1 %v2544_v50, %s2733_s0 }
 0x9fd   :  { %950 = vrot.lane.b32.xlu0 %v2546_v52, %s2733_s0 }
 0x9ff   :  { %v2548_v6 = vpop.eup %2547 }
 0xa00   :  { %814 = vrot.lane.b32.xlu1 %v2548_v6, %s2733_s0 }
 0xa6e   :  { %v949_v7 = vpop.permute.xlu1 %948 }
 0xa6f   :  { %v951_v8 = vpop.permute.xlu0 %950  ;;  %v954_v9 = vmul.f32 %v2538_v42, %v949_v7 }
 0xa70   :  { %v955_v55 = vmul.f32 %v2540_v43, %v951_v8  ;;  %v1163_v8 = vrot.slane %v2959_v63, 7 }
 0xa71   :  { %v958_v11 = vrot.slane %v954_v9, 3  ;;  %v1164_v9 = vrot.slane %v2961_v1, 7 }
 0xa72   :  { %v959_v12 = vrot.slane %v955_v55, 2  ;;  %v815_v14 = vpop.permute.xlu1 %814 }
 0xa73   :  { %v817_v15 = vmul.f32 %v2542_v45, %v815_v14 }
 0xa74   :  { %v960_v16 = vsel %vm224_vm1, %v959_v12, %v958_v11 }
 0xa75   :  { %961 = vrot.lane.b32.xlu0 %v960_v16, %s2736_s30  ;;  %819 = vrot.lane.b32.xlu1 %v817_v15, %s2736_s30 }
 0xae7   :  { %v962_v17 = vpop.permute.xlu0 %961  ;;  %v820_v18 = vpop.permute.xlu1 %819 }
 0xae8   :  { %2243 = vmatmul.mubr.msk.f32.vlgmr.msra.gmra.mxu1 %vm228_vm2, %v962_v17  ;;  %2378 = vmatmul.mubr.msk.f32.vlgmr.msra.gmra.mxu0 %vm228_vm2, %v820_v18 }
 0xae9   :  { %1235 = vmatpush1.msra.mxu1 %v2790_v30  ;;  %2381 = vmatpush3.msra.mxu0 %v2848_v20 }
 0xaea   :  { %1236 = vmatprep.subr.mxu1 %v2792_v31  ;;  %2382 = vmatprep.subr.mxu0 %v2734_v33 }
 0xaeb   :  { %1237 = vmatpush1.msra.mxu1 %v2795_v32  ;;  %2383 = vmatpush3.msra.mxu0 %v2858_v39 }
 0xaec   :  { %1238 = vmatprep.subr.mxu1 %v2799_v34  ;;  %2384 = vmatprep.subr.mxu0 %v2734_v33 }
 0xaed   :  { %1239 = vmatpush1.msra.mxu1 %v2803_v35  ;;  %2385 = vmatpush3.msra.mxu0 %v2863_v40 }
 0xaee   :  { %1240 = vmatprep.subr.mxu1 %v2807_v36  ;;  %2386 = vmatprep.subr.mxu0 %v2734_v33 }
 0xaef   :  { %1241 = vmatpush1.msra.mxu1 %v2811_v38  ;;  %1274 = vmatprep.mubr.f32.mxu1 %v2734_v33 }
 0xaf0   :  { %2387 = vmatpush3.msra.mxu0 %v2866_v41  ;;  %2388 = vmatprep.mubr.msk.f32.mxu0 %vm2737_vm3, %v2734_v33 }
 0xaf1   :  { %1479 = vmatprep.subr.mxu1 %v2788_v29  ;;  %2391 = vmatprep.subr.mxu0 %v2734_v33 }
 0xba8   :  { %v1031_v21 = vpop.f32.mrf.mxu1  ;;  %v889_v22 = vpop.f32.mrf.mxu0 }
 0xba9   :  { %v1139_v23 = vrot.slane %v1031_v21, 4  ;;  %v1140_v24 = vrot.slane %v1031_v21, 5 }
 0xbaa   :  { %v1033_v25 = vpop.f32.mrf.mxu1  ;;  %v2379_v26 = vpop.f32.mrf.mxu0 }
 0xbab   :  { %v1143_v28 = vadd.f32 %v1139_v23, %v2777_v13  ;;  %v1144_v42 = vadd.f32 %v1140_v24, %v2774_v10  ;;  %v1036_v43 = vadd.f32 %v1033_v25, %v889_v22 }
 0xbad   :  { %v2247_v44 = vmul.f32 -1.442695, %v1143_v28  ;;  %v2248_v45 = vmul.f32 -1.442695, %v1144_v42  ;;  %v1037_v46 = vadd.f32 %v1036_v43, %v2831_v48 }
 0xbaf   :  { %2549 = vpow2.f32 %v2247_v44  ;;  %v2244_v47 = vmul.f32 -1.442695, %v1037_v46 }
 0xbb0   :  { %2551 = vpow2.f32 %v2248_v45 }
 0xbb1   :  { %2553 = vpow2.f32 %v2244_v47 }
 0xbbc   :  { %v2550_v49 = vpop.eup %2549 }
 0xbbd   :  { %v2552_v51 = vpop.eup %2551  ;;  %v1151_v53 = vadd.f32 1.0, %v2550_v49 }
 0xbbe   :  { %v2554_v19 = vpop.eup %2553  ;;  %v1152_v54 = vadd.f32 1.0, %v2552_v51 }
 0xbbf   :  { %2555 = vrcp.f32 %v1151_v53  ;;  %v1041_v27 = vadd.f32 1.0, %v2554_v19 }
 0xbc0   :  { %2557 = vrcp.f32 %v1152_v54 }
 0xbc1   :  { %2559 = vrcp.f32 %v1041_v27 }
 0xbcc   :  { %v2556_v37 = vpop.eup %2555 }
 0xbcd   :  { %v2558_v56 = vpop.eup %2557  ;;  %v1157_v57 = vmul.f32 2.0, %v2556_v37  ;;  %v1167_v55 = vmul.f32 %v2556_v37, %v1163_v8 }
 0xbce   :  { %v2560_v58 = vpop.eup %2559  ;;  %v1158_v59 = vmul.f32 2.0, %v2558_v56  ;;  %v1168_v11 = vmul.f32 %v2558_v56, %v1164_v9 }
 0xbcf   :  { %v2249_v60 = vadd.f32 -1.0, %v1157_v57  ;;  %v1044_v61 = vmul.f32 2.0, %v2560_v58  ;;  %v1046_v17 = vmul.f32 %v2560_v58, %v2966_v4 }
 0xbd0   :  { %v2250_v62 = vadd.f32 -1.0, %v1158_v59 }
 0xbd1   :  { %1171 = vrot.lane.b32.xlu0 %v2249_v60, %s2733_s0  ;;  %v2245_v0 = vadd.f32 -1.0, %v1044_v61 }
 0xbd2   :  { %1173 = vrot.lane.b32.xlu1 %v2250_v62, %s2733_s0 }
 0xbd5   :  { %1048 = vrot.lane.b32.xlu0 %v2245_v0, %s2733_s0 }
 0xc43   :  { %v1172_v2 = vpop.permute.xlu0 %1171 }
 0xc44   :  { %v1177_v3 = vmul.f32 %v2556_v37, %v1172_v2  ;;  %v1174_v50 = vpop.permute.xlu1 %1173 }
 0xc45   :  { %v1178_v52 = vmul.f32 %v2558_v56, %v1174_v50 }
 0xc46   :  { %1181 = vrot.lane.b32.xlu1 %v1177_v3, %s2736_s30 }
 0xc47   :  { %1183 = vrot.lane.b32.xlu0 %v1178_v52, %s2736_s30  ;;  %v1049_v6 = vpop.permute.xlu0 %1048 }
 0xc48   :  { %v1051_v7 = vmul.f32 %v2560_v58, %v1049_v6 }
 0xc4a   :  { %1053 = vrot.lane.b32.xlu1 %v1051_v7, %s2736_s30 }
 0xcb8   :  { %v1182_v12 = vpop.permute.xlu1 %1181 }
 0xcb9   :  { %v1184_v14 = vpop.permute.xlu0 %1183  ;;  %v3007_v15 = vadd.f32 %v1182_v12, %v1167_v55 }
 0xcba   :  { %v3009_v16 = vadd.f32 %v1184_v14, %v1168_v11 }
 0xcbb   :  { %2561 = vtanh.f32 %v3007_v15  ;;  %v1408_v12 = vrot.slane %v3007_v15, 7 }
 0xcbc   :  { %2563 = vtanh.f32 %v3009_v16  ;;  %v1054_v18 = vpop.permute.xlu1 %1053  ;;  %v1409_v14 = vrot.slane %v3009_v16, 7 }
 0xcbd   :  { %v3014_v21 = vadd.f32 %v1054_v18, %v1046_v17 }
 0xcbf   :  { %2565 = vtanh.f32 %v3014_v21 }
 0xcc8   :  { %v2562_v63 = vpop.eup %2561 }
 0xcc9   :  { %v2564_v1 = vpop.eup %2563  ;;  %1193 = vrot.lane.b32.xlu0 %v2562_v63, %s2733_s0 }
 0xcca   :  { %1195 = vrot.lane.b32.xlu1 %v2564_v1, %s2733_s0 }
 0xccc   :  { %v2566_v22 = vpop.eup %2565 }
 0xccd   :  { %1059 = vrot.lane.b32.xlu0 %v2566_v22, %s2733_s0 }
 0xd3b   :  { %v1194_v23 = vpop.permute.xlu0 %1193 }
 0xd3c   :  { %v1199_v24 = vmul.f32 %v2556_v37, %v1194_v23  ;;  %v1196_v25 = vpop.permute.xlu1 %1195 }
 0xd3d   :  { %v1200_v4 = vmul.f32 %v2558_v56, %v1196_v25 }
 0xd3e   :  { %v1203_v26 = vrot.slane %v1199_v24, 4 }
 0xd3f   :  { %v1204_v28 = vrot.slane %v1200_v4, 3  ;;  %v1060_v42 = vpop.permute.xlu0 %1059 }
 0xd40   :  { %v1062_v43 = vmul.f32 %v2560_v58, %v1060_v42 }
 0xd41   :  { %v1205_v44 = vsel %vm224_vm1, %v1204_v28, %v1203_v26 }
 0xd42   :  { %1206 = vrot.lane.b32.xlu1 %v1205_v44, %s2736_s30  ;;  %1064 = vrot.lane.b32.xlu0 %v1062_v43, %s2736_s30 }
 0xdb4   :  { %v1207_v45 = vpop.permute.xlu1 %1206  ;;  %v1065_v46 = vpop.permute.xlu0 %1064 }
 0xdb5   :  { %2251 = vmatmul.mubr.msk.f32.vlgmr.msra.gmra.mxu1 %vm228_vm2, %v1207_v45  ;;  %2389 = vmatmul.mubr.msk.f32.vlgmr.msra.gmra.mxu0 %vm228_vm2, %v1065_v46 }
 0xdb6   :  { %1480 = vmatpush1.msra.mxu1 %v2790_v30  ;;  %2392 = vmatpush3.msra.mxu0 %v2848_v20 }
 0xdb7   :  { %1481 = vmatprep.subr.mxu1 %v2792_v31  ;;  %2393 = vmatprep.subr.mxu0 %v2734_v33 }
 0xdb8   :  { %1482 = vmatpush1.msra.mxu1 %v2795_v32  ;;  %2394 = vmatpush3.msra.mxu0 %v2858_v39 }
 0xdb9   :  { %1483 = vmatprep.subr.mxu1 %v2799_v34  ;;  %2395 = vmatprep.subr.mxu0 %v2734_v33 }
 0xdba   :  { %1484 = vmatpush1.msra.mxu1 %v2803_v35  ;;  %2396 = vmatpush3.msra.mxu0 %v2863_v40 }
 0xdbb   :  { %1485 = vmatprep.subr.mxu1 %v2807_v36  ;;  %2397 = vmatprep.subr.mxu0 %v2734_v33 }
 0xdbc   :  { %1486 = vmatpush1.msra.mxu1 %v2811_v38  ;;  %1519 = vmatprep.mubr.f32.mxu1 %v2734_v33 }
 0xdbd   :  { %2398 = vmatpush3.msra.mxu0 %v2866_v41  ;;  %2399 = vmatprep.mubr.msk.f32.mxu0 %vm2737_vm3, %v2734_v33 }
 0xdbe   :  { %1724 = vmatprep.subr.mxu1 %v2788_v29  ;;  %2402 = vmatprep.subr.mxu0 %v2734_v33 }
 0xe75   :  { %v1276_v30 = vpop.f32.mrf.mxu1  ;;  %v1134_v31 = vpop.f32.mrf.mxu0 }
 0xe76   :  { %v1384_v32 = vrot.slane %v1276_v30, 3  ;;  %v1385_v34 = vrot.slane %v1276_v30, 4 }
 0xe77   :  { %v1278_v35 = vpop.f32.mrf.mxu1  ;;  %v2390_v36 = vpop.f32.mrf.mxu0 }
 0xe78   :  { %v1388_v47 = vadd.f32 %v1384_v32, %v2777_v13  ;;  %v1389_v38 = vadd.f32 %v1385_v34, %v2774_v10  ;;  %v1281_v49 = vadd.f32 %v1278_v35, %v1134_v31  ;;  %v3073_v35 = vld [vmem:[#allocation7 + $0x30] sm:$0xff]  ;;  %v3077_v36 = vld [vmem:[#allocation7 + $0x28] sm:$0xff] }
 0xe7a   :  { %v2255_v51 = vmul.f32 -1.442695, %v1388_v47  ;;  %v2256_v53 = vmul.f32 -1.442695, %v1389_v38  ;;  %v1282_v19 = vadd.f32 %v1281_v49, %v2831_v48  ;;  %v3081_v47 = vld [vmem:[#allocation7 + $0x20] sm:$0xff]  ;;  %v3085_v38 = vld [vmem:[#allocation7 + $0x18] sm:$0xff] }
 0xe7b   :  { %v3089_v49 = vld [vmem:[#allocation7 + $0x10] sm:$0xff] }
 0xe7c   :  { %2567 = vpow2.f32 %v2255_v51  ;;  %v2252_v54 = vmul.f32 -1.442695, %v1282_v19  ;;  %v3097_v51 = vld [vmem:[#allocation7] sm:$0xff] }
 0xe7d   :  { %2569 = vpow2.f32 %v2256_v53 }
 0xe7e   :  { %2571 = vpow2.f32 %v2252_v54 }
 0xe89   :  { %v2568_v29 = vpop.eup %2567 }
 0xe8a   :  { %v2570_v27 = vpop.eup %2569  ;;  %v1396_v37 = vadd.f32 1.0, %v2568_v29 }
 0xe8b   :  { %v2572_v56 = vpop.eup %2571  ;;  %v1397_v57 = vadd.f32 1.0, %v2570_v27 }
 0xe8c   :  { %2573 = vrcp.f32 %v1396_v37  ;;  %v1286_v58 = vadd.f32 1.0, %v2572_v56 }
 0xe8d   :  { %2575 = vrcp.f32 %v1397_v57 }
 0xe8e   :  { %2577 = vrcp.f32 %v1286_v58 }
 0xe99   :  { %v2574_v59 = vpop.eup %2573 }
 0xe9a   :  { %v2576_v60 = vpop.eup %2575  ;;  %v1402_v61 = vmul.f32 2.0, %v2574_v59  ;;  %v1412_v17 = vmul.f32 %v2574_v59, %v1408_v12 }
 0xe9b   :  { %v2578_v62 = vpop.eup %2577  ;;  %v1403_v0 = vmul.f32 2.0, %v2576_v60  ;;  %v1413_v63 = vmul.f32 %v2576_v60, %v1409_v14 }
 0xe9c   :  { %v2257_v2 = vadd.f32 -1.0, %v1402_v61  ;;  %v1289_v3 = vmul.f32 2.0, %v2578_v62  ;;  %v1291_v24 = vmul.f32 %v2578_v62, %v3014_v21 }
 0xe9d   :  { %v2258_v50 = vadd.f32 -1.0, %v1403_v0 }
 0xe9e   :  { %1416 = vrot.lane.b32.xlu1 %v2257_v2, %s2733_s0  ;;  %v2253_v52 = vadd.f32 -1.0, %v1289_v3 }
 0xe9f   :  { %1418 = vrot.lane.b32.xlu0 %v2258_v50, %s2733_s0 }
 0xea2   :  { %1293 = vrot.lane.b32.xlu1 %v2253_v52, %s2733_s0 }
 0xf10   :  { %v1417_v6 = vpop.permute.xlu1 %1416 }
 0xf11   :  { %v1419_v7 = vpop.permute.xlu0 %1418  ;;  %v1422_v8 = vmul.f32 %v2574_v59, %v1417_v6 }
 0xf12   :  { %v1423_v9 = vmul.f32 %v2576_v60, %v1419_v7 }
 0xf13   :  { %1426 = vrot.lane.b32.xlu0 %v1422_v8, %s2736_s30 }
 0xf14   :  { %1428 = vrot.lane.b32.xlu1 %v1423_v9, %s2736_s30  ;;  %v1294_v55 = vpop.permute.xlu1 %1293 }
 0xf15   :  { %v1296_v11 = vmul.f32 %v2578_v62, %v1294_v55 }
 0xf17   :  { %1298 = vrot.lane.b32.xlu0 %v1296_v11, %s2736_s30 }
 0xf85   :  { %v1427_v18 = vpop.permute.xlu0 %1426 }
 0xf86   :  { %v3055_v1 = vadd.f32 %v1427_v18, %v1412_v17  ;;  %v1429_v22 = vpop.permute.xlu1 %1428 }
 0xf87   :  { %v3057_v23 = vadd.f32 %v1429_v22, %v1413_v63 }
 0xf88   :  { %2579 = vtanh.f32 %v3055_v1 }
 0xf89   :  { %2581 = vtanh.f32 %v3057_v23  ;;  %v1299_v25 = vpop.permute.xlu0 %1298 }
 0xf8a   :  { %v3062_v4 = vadd.f32 %v1299_v25, %v1291_v24 }
 0xf8c   :  { %2583 = vtanh.f32 %v3062_v4 }
 0xf95   :  { %v2580_v15 = vpop.eup %2579 }
 0xf96   :  { %v2582_v16 = vpop.eup %2581  ;;  %1438 = vrot.lane.b32.xlu1 %v2580_v15, %s2733_s0  ;;  %v1653_v15 = vrot.slane %v3055_v1, 7 }
 0xf97   :  { %1440 = vrot.lane.b32.xlu0 %v2582_v16, %s2733_s0  ;;  %v1654_v16 = vrot.slane %v3057_v23, 7 }
 0xf99   :  { %v2584_v26 = vpop.eup %2583 }
 0xf9a   :  { %1304 = vrot.lane.b32.xlu1 %v2584_v26, %s2733_s0 }
0x1008   :  { %v1439_v28 = vpop.permute.xlu1 %1438 }
0x1009   :  { %v1441_v42 = vpop.permute.xlu0 %1440  ;;  %v1444_v43 = vmul.f32 %v2574_v59, %v1439_v28 }
0x100a   :  { %v1445_v21 = vmul.f32 %v2576_v60, %v1441_v42 }
0x100b   :  { %v1448_v44 = vrot.slane %v1444_v43, 5 }
0x100c   :  { %v1449_v45 = vrot.slane %v1445_v21, 4  ;;  %v1305_v46 = vpop.permute.xlu1 %1304 }
0x100d   :  { %v1307_v30 = vmul.f32 %v2578_v62, %v1305_v46 }
0x100e   :  { %v1450_v31 = vsel %vm224_vm1, %v1449_v45, %v1448_v44 }
0x100f   :  { %1451 = vrot.lane.b32.xlu0 %v1450_v31, %s2736_s30  ;;  %1309 = vrot.lane.b32.xlu1 %v1307_v30, %s2736_s30 }
0x1081   :  { %v1452_v32 = vpop.permute.xlu0 %1451  ;;  %v1310_v34 = vpop.permute.xlu1 %1309 }
0x1082   :  { %2259 = vmatmul.mubr.msk.f32.vlgmr.msra.gmra.mxu1 %vm228_vm2, %v1452_v32  ;;  %2400 = vmatmul.mubr.msk.f32.vlgmr.msra.gmra.mxu0 %vm228_vm2, %v1310_v34 }
0x1083   :  { %1725 = vmatpush1.msra.mxu1 %v3073_v35  ;;  %2403 = vmatpush3.msra.mxu0 %v2848_v20  ;;  %v3093_v20 = vld [vmem:[#allocation7 + $0x8] sm:$0xff] }
0x1084   :  { %1726 = vmatprep.subr.mxu1 %v3077_v36  ;;  %2404 = vmatprep.subr.mxu0 %v2734_v33 }
0x1085   :  { %1727 = vmatpush1.msra.mxu1 %v3081_v47  ;;  %2405 = vmatpush3.msra.mxu0 %v2858_v39  ;;  %v2634_v39 = vld [vmem:[#allocation7 + $0x38] sm:$0xff] }
0x1086   :  { %1728 = vmatprep.subr.mxu1 %v3085_v38  ;;  %2406 = vmatprep.subr.mxu0 %v2734_v33 }
0x1087   :  { %1729 = vmatpush1.msra.mxu1 %v3089_v49  ;;  %2407 = vmatpush3.msra.mxu0 %v2863_v40 }
0x1088   :  { %1730 = vmatprep.subr.mxu1 %v3093_v20  ;;  %2408 = vmatprep.subr.mxu0 %v2734_v33 }
0x1089   :  { %1731 = vmatpush1.msra.mxu1 %v3097_v51  ;;  %1764 = vmatprep.mubr.f32.mxu1 %v2734_v33 }
0x108a   :  { %2409 = vmatpush3.msra.mxu0 %v2866_v41  ;;  %2410 = vmatprep.mubr.msk.f32.mxu0 %vm2737_vm3, %v2734_v33 }
0x108b   :  { %1969 = vmatprep.subr.mxu1 %v2634_v39  ;;  %2413 = vmatprep.subr.mxu0 %v2734_v33 }
0x1142   :  { %v1521_v40 = vpop.f32.mrf.mxu1  ;;  %v1379_v53 = vpop.f32.mrf.mxu0 }
0x1143   :  { %v1629_v19 = vrot.slane %v1521_v40, 2  ;;  %v1630_v54 = vrot.slane %v1521_v40, 3 }
0x1144   :  { %v1523_v29 = vpop.f32.mrf.mxu1  ;;  %v2401_v27 = vpop.f32.mrf.mxu0 }
0x1145   :  { %v1633_v37 = vadd.f32 %v1629_v19, %v2777_v13  ;;  %v1634_v56 = vadd.f32 %v1630_v54, %v2774_v10  ;;  %v1526_v57 = vadd.f32 %v1523_v29, %v1379_v53 }
0x1147   :  { %v2263_v58 = vmul.f32 -1.442695, %v1633_v37  ;;  %v2264_v41 = vmul.f32 -1.442695, %v1634_v56  ;;  %v1527_v59 = vadd.f32 %v1526_v57, %v2831_v48  ;;  %v2635_v56 = vld [vmem:[#allocation5 + $0x28] sm:$0xff]  ;;  %v2636_v57 = vld [vmem:[#allocation5 + $0x20] sm:$0xff] }
0x1149   :  { %2585 = vpow2.f32 %v2263_v58  ;;  %v2260_v60 = vmul.f32 -1.442695, %v1527_v59  ;;  %v2637_v58 = vld [vmem:[#allocation5 + $0x18] sm:$0xff] }
0x114a   :  { %2587 = vpow2.f32 %v2264_v41 }
0x114b   :  { %2589 = vpow2.f32 %v2260_v60 }
0x1156   :  { %v2586_v61 = vpop.eup %2585 }
0x1157   :  { %v2588_v62 = vpop.eup %2587  ;;  %v1641_v0 = vadd.f32 1.0, %v2586_v61 }
0x1158   :  { %v2590_v2 = vpop.eup %2589  ;;  %v1642_v3 = vadd.f32 1.0, %v2588_v62 }
0x1159   :  { %2591 = vrcp.f32 %v1641_v0  ;;  %v1531_v50 = vadd.f32 1.0, %v2590_v2 }
0x115a   :  { %2593 = vrcp.f32 %v1642_v3 }
0x115b   :  { %2595 = vrcp.f32 %v1531_v50 }
0x1166   :  { %v2592_v52 = vpop.eup %2591 }
0x1167   :  { %v2594_v6 = vpop.eup %2593  ;;  %v1647_v7 = vmul.f32 2.0, %v2592_v52  ;;  %v1657_v26 = vmul.f32 %v2592_v52, %v1653_v15 }
0x1168   :  { %v2596_v8 = vpop.eup %2595  ;;  %v1648_v9 = vmul.f32 2.0, %v2594_v6  ;;  %v1658_v28 = vmul.f32 %v2594_v6, %v1654_v16 }
0x1169   :  { %v2265_v55 = vadd.f32 -1.0, %v1647_v7  ;;  %v1534_v11 = vmul.f32 2.0, %v2596_v8  ;;  %v1536_v45 = vmul.f32 %v2596_v8, %v3062_v4 }
0x116a   :  { %v2266_v12 = vadd.f32 -1.0, %v1648_v9 }
0x116b   :  { %1661 = vrot.lane.b32.xlu0 %v2265_v55, %s2733_s0  ;;  %v2261_v14 = vadd.f32 -1.0, %v1534_v11 }
0x116c   :  { %1663 = vrot.lane.b32.xlu1 %v2266_v12, %s2733_s0 }
0x116f   :  { %1538 = vrot.lane.b32.xlu0 %v2261_v14, %s2733_s0 }
0x11dd   :  { %v1662_v17 = vpop.permute.xlu0 %1661 }
0x11de   :  { %v1667_v18 = vmul.f32 %v2592_v52, %v1662_v17  ;;  %v1664_v63 = vpop.permute.xlu1 %1663 }
0x11df   :  { %v1668_v22 = vmul.f32 %v2594_v6, %v1664_v63 }
0x11e0   :  { %1671 = vrot.lane.b32.xlu1 %v1667_v18, %s2736_s30 }
0x11e1   :  { %1673 = vrot.lane.b32.xlu0 %v1668_v22, %s2736_s30  ;;  %v1539_v24 = vpop.permute.xlu0 %1538 }
0x11e2   :  { %v1541_v25 = vmul.f32 %v2596_v8, %v1539_v24 }
0x11e4   :  { %1543 = vrot.lane.b32.xlu1 %v1541_v25, %s2736_s30 }
0x1252   :  { %v1672_v42 = vpop.permute.xlu1 %1671 }
0x1253   :  { %v1674_v43 = vpop.permute.xlu0 %1673  ;;  %v3116_v21 = vadd.f32 %v1672_v42, %v1657_v26 }
0x1254   :  { %v3118_v44 = vadd.f32 %v1674_v43, %v1658_v28 }
0x1255   :  { %2597 = vtanh.f32 %v3116_v21  ;;  %v1898_v26 = vrot.slane %v3116_v21, 7 }
0x1256   :  { %2599 = vtanh.f32 %v3118_v44  ;;  %v1544_v46 = vpop.permute.xlu1 %1543  ;;  %v1899_v28 = vrot.slane %v3118_v44, 7 }
0x1257   :  { %v3123_v30 = vadd.f32 %v1544_v46, %v1536_v45 }
0x1259   :  { %2601 = vtanh.f32 %v3123_v30 }
0x1262   :  { %v2598_v1 = vpop.eup %2597 }
0x1263   :  { %v2600_v23 = vpop.eup %2599  ;;  %1683 = vrot.lane.b32.xlu0 %v2598_v1, %s2733_s0 }
0x1264   :  { %1685 = vrot.lane.b32.xlu1 %v2600_v23, %s2733_s0 }
0x1266   :  { %v2602_v31 = vpop.eup %2601 }
0x1267   :  { %1549 = vrot.lane.b32.xlu0 %v2602_v31, %s2733_s0 }
0x12d5   :  { %v1684_v32 = vpop.permute.xlu0 %1683 }
0x12d6   :  { %v1689_v34 = vmul.f32 %v2592_v52, %v1684_v32  ;;  %v1686_v39 = vpop.permute.xlu1 %1685 }
0x12d7   :  { %v1690_v4 = vmul.f32 %v2594_v6, %v1686_v39 }
0x12d8   :  { %v1693_v40 = vrot.slane %v1689_v34, 6 }
0x12d9   :  { %v1694_v53 = vrot.slane %v1690_v4, 5  ;;  %v1550_v19 = vpop.permute.xlu0 %1549 }
0x12da   :  { %v1552_v54 = vmul.f32 %v2596_v8, %v1550_v19 }
0x12db   :  { %v1695_v29 = vsel %vm224_vm1, %v1694_v53, %v1693_v40 }
0x12dc   :  { %1696 = vrot.lane.b32.xlu1 %v1695_v29, %s2736_s30  ;;  %1554 = vrot.lane.b32.xlu0 %v1552_v54, %s2736_s30 }
0x134e   :  { %v1697_v27 = vpop.permute.xlu1 %1696  ;;  %v1555_v37 = vpop.permute.xlu0 %1554 }
0x134f   :  { %2267 = vmatmul.mubr.msk.f32.vlgmr.msra.gmra.mxu1 %vm228_vm2, %v1697_v27  ;;  %2411 = vmatmul.mubr.msk.f32.vlgmr.msra.gmra.mxu0 %vm228_vm2, %v1555_v37 }
0x1350   :  { %1970 = vmatpush1.msra.mxu1 %v3073_v35  ;;  %2414 = vmatpush3.msra.mxu0 %v2635_v56  ;;  %v2638_v35 = vld [vmem:[#allocation5 + $0x10] sm:$0xff] }
0x1351   :  { %1971 = vmatprep.subr.mxu1 %v3077_v36  ;;  %2415 = vmatprep.subr.mxu0 %v2734_v33 }
0x1352   :  { %1972 = vmatpush1.msra.mxu1 %v3081_v47  ;;  %2416 = vmatpush3.msra.mxu0 %v2636_v57 }
0x1353   :  { %1973 = vmatprep.subr.mxu1 %v3085_v38  ;;  %2417 = vmatprep.subr.mxu0 %v2734_v33 }
0x1354   :  { %1974 = vmatpush1.msra.mxu1 %v3089_v49  ;;  %2418 = vmatpush3.msra.mxu0 %v2637_v58 }
0x1355   :  { %1975 = vmatprep.subr.mxu1 %v3093_v20  ;;  %2419 = vmatprep.subr.mxu0 %v2734_v33 }
0x1356   :  { %1976 = vmatpush1.msra.mxu1 %v3097_v51  ;;  %2009 = vmatprep.mubr.f32.mxu1 %v2734_v33 }
0x1357   :  { %2420 = vmatpush3.msra.mxu0 %v2638_v35  ;;  %2421 = vmatprep.mubr.msk.f32.mxu0 %vm2737_vm3, %v2734_v33 }
0x1358   :  { %2424 = vmatprep.subr.mxu0 %v2734_v33  ;;  %2435 = vmatprep.subr.mxu1 %v2734_v33 }
0x140f   :  { %v1766_v36 = vpop.f32.mrf.mxu1  ;;  %v1624_v47 = vpop.f32.mrf.mxu0 }
0x1410   :  { %v1874_v38 = vrot.slane %v1766_v36, 1  ;;  %v1875_v49 = vrot.slane %v1766_v36, 2 }
0x1411   :  { %v1768_v20 = vpop.f32.mrf.mxu1  ;;  %v2412_v41 = vpop.f32.mrf.mxu0 }
0x1412   :  { %v1878_v59 = vadd.f32 %v1874_v38, %v2777_v13  ;;  %v1879_v51 = vadd.f32 %v1875_v49, %v2774_v10  ;;  %v1771_v60 = vadd.f32 %v1768_v20, %v1624_v47 }
0x1414   :  { %v2271_v61 = vmul.f32 -1.442695, %v1878_v59  ;;  %v2272_v62 = vmul.f32 -1.442695, %v1879_v51  ;;  %v1772_v0 = vadd.f32 %v1771_v60, %v2831_v48 }
0x1416   :  { %2603 = vpow2.f32 %v2271_v61  ;;  %v2268_v2 = vmul.f32 -1.442695, %v1772_v0 }
0x1417   :  { %2605 = vpow2.f32 %v2272_v62 }
0x1418   :  { %2607 = vpow2.f32 %v2268_v2 }
0x1423   :  { %v2604_v3 = vpop.eup %2603 }
0x1424   :  { %v2606_v50 = vpop.eup %2605  ;;  %v1886_v52 = vadd.f32 1.0, %v2604_v3 }
0x1425   :  { %v2608_v6 = vpop.eup %2607  ;;  %v1887_v7 = vadd.f32 1.0, %v2606_v50 }
0x1426   :  { %2609 = vrcp.f32 %v1886_v52  ;;  %v1776_v8 = vadd.f32 1.0, %v2608_v6  ;;  %v65_v52 = vld [vmem:[#allocation5 + $0x48] sm:$0xff]  ;;  %v63_v6 = vld [vmem:[#allocation5 + $0x38] sm:$0xff] }
0x1427   :  { %2611 = vrcp.f32 %v1887_v7  ;;  %v62_v7 = vld [vmem:[#allocation5 + $0x30] sm:$0xff] }
0x1428   :  { %2613 = vrcp.f32 %v1776_v8 }
0x1433   :  { %v2610_v13 = vpop.eup %2609 }
0x1434   :  { %v2612_v10 = vpop.eup %2611  ;;  %v1892_v9 = vmul.f32 2.0, %v2610_v13  ;;  %v1902_v42 = vmul.f32 %v2610_v13, %v1898_v26 }
0x1435   :  { %v2614_v55 = vpop.eup %2613  ;;  %v1893_v11 = vmul.f32 2.0, %v2612_v10  ;;  %v1903_v45 = vmul.f32 %v2612_v10, %v1899_v28  ;;  %v68_v28 = vld [vmem:[#allocation5 + $0x60] sm:$0xff] }
0x1436   :  { %v2273_v12 = vadd.f32 -1.0, %v1892_v9  ;;  %v1779_v14 = vmul.f32 2.0, %v2614_v55  ;;  %v1781_v31 = vmul.f32 %v2614_v55, %v3123_v30  ;;  %v79_v9 = vld [vmem:[#allocation5 + $0xb8] sm:$0xff] }
0x1437   :  { %v2274_v17 = vadd.f32 -1.0, %v1893_v11  ;;  %v77_v11 = vld [vmem:[#allocation5 + $0xa8] sm:$0xff] }
0x1438   :  { %1906 = vrot.lane.b32.xlu1 %v2273_v12, %s2733_s0  ;;  %v2269_v18 = vadd.f32 -1.0, %v1779_v14  ;;  %v76_v12 = vld [vmem:[#allocation5 + $0xa0] sm:$0xff] }
0x1439   :  { %1908 = vrot.lane.b32.xlu0 %v2274_v17, %s2733_s0  ;;  %v75_v17 = vld [vmem:[#allocation5 + $0x98] sm:$0xff] }
0x143c   :  { %1783 = vrot.lane.b32.xlu1 %v2269_v18, %s2733_s0 }
0x14aa   :  { %v1907_v63 = vpop.permute.xlu1 %1906 }
0x14ab   :  { %v1909_v22 = vpop.permute.xlu0 %1908  ;;  %v1912_v24 = vmul.f32 %v2610_v13, %v1907_v63  ;;  %v74_v63 = vld [vmem:[#allocation5 + $0x90] sm:$0xff] }
0x14ac   :  { %v1913_v25 = vmul.f32 %v2612_v10, %v1909_v22  ;;  %v73_v22 = vld [vmem:[#allocation5 + $0x88] sm:$0xff] }
0x14ad   :  { %1916 = vrot.lane.b32.xlu0 %v1912_v24, %s2736_s30  ;;  %v72_v24 = vld [vmem:[#allocation5 + $0x80] sm:$0xff] }
0x14ae   :  { %1918 = vrot.lane.b32.xlu1 %v1913_v25, %s2736_s30  ;;  %v1784_v15 = vpop.permute.xlu1 %1783  ;;  %v71_v25 = vld [vmem:[#allocation5 + $0x78] sm:$0xff] }
0x14af   :  { %v1786_v16 = vmul.f32 %v2614_v55, %v1784_v15  ;;  %v70_v15 = vld [vmem:[#allocation5 + $0x70] sm:$0xff] }
0x14b1   :  { %1788 = vrot.lane.b32.xlu0 %v1786_v16, %s2736_s30  ;;  %v69_v16 = vld [vmem:[#allocation5 + $0x68] sm:$0xff] }
0x151f   :  { %v1917_v43 = vpop.permute.xlu0 %1916 }
0x1520   :  { %v1922_v46 = vadd.f32 %v1917_v43, %v1902_v42  ;;  %v1919_v1 = vpop.permute.xlu1 %1918  ;;  %v67_v42 = vld [vmem:[#allocation5 + $0x58] sm:$0xff]  ;;  %v66_v43 = vld [vmem:[#allocation5 + $0x50] sm:$0xff] }
0x1521   :  { %v1923_v23 = vadd.f32 %v1919_v1, %v1903_v45  ;;  %v2044_v45 = vsub.s32 2, %v2768_v5 }
0x1522   :  { %2615 = vtanh.f32 %v1922_v46  ;;  %v2639_v46 = vld [vmem:[#allocation5 + $0xd0] sm:$0xff] }
0x1523   :  { %2617 = vtanh.f32 %v1923_v23  ;;  %v1789_v32 = vpop.permute.xlu0 %1788  ;;  %v2045_v1 = vrot.slane %v2639_v46, %v2044_v45 }
0x1524   :  { %v1791_v34 = vadd.f32 %v1789_v32, %v1781_v31 }
0x1526   :  { %2619 = vtanh.f32 %v1791_v34 }
0x152f   :  { %v2616_v39 = vpop.eup %2615 }
0x1530   :  { %v2618_v4 = vpop.eup %2617  ;;  %1928 = vrot.lane.b32.xlu1 %v2616_v39, %s2733_s0  ;;  %v2124_v39 = vsub.s32 3, %v2768_v5 }
0x1531   :  { %1930 = vrot.lane.b32.xlu0 %v2618_v4, %s2733_s0 }
0x1532   :  { %v2125_v4 = vrot.slane %v2639_v46, %v2124_v39 }
0x1533   :  { %v2620_v21 = vpop.eup %2619 }
0x1534   :  { %1794 = vrot.lane.b32.xlu1 %v2620_v21, %s2733_s0 }
0x15a2   :  { %v1929_v44 = vpop.permute.xlu1 %1928 }
0x15a3   :  { %v1931_v40 = vpop.permute.xlu0 %1930  ;;  %v1934_v53 = vmul.f32 %v2610_v13, %v1929_v44  ;;  %v81_v13 = vld [vmem:[#allocation5 + $0xc8] sm:$0xff] }
0x15a4   :  { %v1935_v19 = vmul.f32 %v2612_v10, %v1931_v40  ;;  %v80_v10 = vld [vmem:[#allocation5 + $0xc0] sm:$0xff] }
0x15a5   :  { %v1938_v54 = vrot.slane %v1934_v53, 7 }
0x15a6   :  { %v1939_v29 = vrot.slane %v1935_v19, 6  ;;  %v1795_v30 = vpop.permute.xlu1 %1794 }
0x15a7   :  { %v1797_v27 = vmul.f32 %v2614_v55, %v1795_v30  ;;  %v78_v55 = vld [vmem:[#allocation5 + $0xb0] sm:$0xff] }
0x15a8   :  { %v1940_v37 = vsel %vm224_vm1, %v1939_v29, %v1938_v54 }
0x15a9   :  { %1941 = vrot.lane.b32.xlu0 %v1940_v37, %s2736_s30  ;;  %1799 = vrot.lane.b32.xlu1 %v1797_v27, %s2736_s30 }
0x161b   :  { %v1942_v56 = vpop.permute.xlu0 %1941  ;;  %v1800_v57 = vpop.permute.xlu1 %1799 }
0x161c   :  { %2275 = vmatmul.mubr.msk.f32.vlgmr.msra.gmra.mxu1 %vm228_vm2, %v1942_v56  ;;  %2422 = vmatmul.mubr.msk.f32.vlgmr.msra.gmra.mxu0 %vm228_vm2, %v1800_v57 }
0x161d   :  { %2432 = vmatprep.mubr.msk.f32.mxu0 %vm2737_vm3, %v2734_v33  ;;  %2467 = vmatprep.mubr.msk.f32.mxu1 %vm2737_vm3, %v2734_v33 }
0x161e   :  { %2425 = vmatpush3.msra.mxu0 %v65_v52  ;;  %2436 = vmatpush3.msra.mxu1 %v81_v13 }
0x161f   :  { %2426 = vmatprep.subr.mxu0 %v2734_v33  ;;  %2437 = vmatprep.subr.mxu1 %v2734_v33 }
0x1620   :  { %2438 = vmatpush3.msra.mxu1 %v80_v10 }
0x1621   :  { %2439 = vmatprep.subr.mxu1 %v2734_v33 }
0x1622   :  { %2440 = vmatpush3.msra.mxu1 %v79_v9 }
0x1623   :  { %2441 = vmatprep.subr.mxu1 %v2734_v33 }
0x1624   :  { %2442 = vmatpush3.msra.mxu1 %v78_v55 }
0x1625   :  { %2443 = vmatprep.subr.mxu1 %v2734_v33 }
0x1626   :  { %2444 = vmatpush3.msra.mxu1 %v77_v11 }
0x1627   :  { %2445 = vmatprep.subr.mxu1 %v2734_v33 }
0x1628   :  { %2446 = vmatpush3.msra.mxu1 %v76_v12 }
0x1629   :  { %2447 = vmatprep.subr.mxu1 %v2734_v33 }
0x162a   :  { %2448 = vmatpush3.msra.mxu1 %v75_v17 }
0x162b   :  { %2449 = vmatprep.subr.mxu1 %v2734_v33 }
0x162c   :  { %2450 = vmatpush3.msra.mxu1 %v74_v63 }
0x162d   :  { %2451 = vmatprep.subr.mxu1 %v2734_v33 }
0x162e   :  { %2452 = vmatpush3.msra.mxu1 %v73_v22 }
0x162f   :  { %2453 = vmatprep.subr.mxu1 %v2734_v33 }
0x1630   :  { %2454 = vmatpush3.msra.mxu1 %v72_v24 }
0x1631   :  { %2455 = vmatprep.subr.mxu1 %v2734_v33 }
0x1632   :  { %2456 = vmatpush3.msra.mxu1 %v71_v25 }
0x1633   :  { %2457 = vmatprep.subr.mxu1 %v2734_v33 }
0x1634   :  { %2458 = vmatpush3.msra.mxu1 %v70_v15 }
0x1635   :  { %2459 = vmatprep.subr.mxu1 %v2734_v33 }
0x1636   :  { %2460 = vmatpush3.msra.mxu1 %v69_v16 }
0x1637   :  { %2461 = vmatprep.subr.mxu1 %v2734_v33 }
0x1638   :  { %2462 = vmatpush3.msra.mxu1 %v68_v28 }
0x1639   :  { %2463 = vmatprep.subr.mxu1 %v2734_v33 }
0x163a   :  { %2464 = vmatpush3.msra.mxu1 %v67_v42 }
0x163b   :  { %2465 = vmatprep.subr.mxu1 %v2734_v33 }
0x163c   :  { %2466 = vmatpush3.msra.mxu1 %v66_v43 }
0x16dc   :  { %v2011_v58 = vpop.f32.mrf.mxu1  ;;  %v1869_v35 = vpop.f32.mrf.mxu0 }
0x16de   :  { %v2012_v36 = vpop.f32.mrf.mxu1  ;;  %v2423_v47 = vpop.f32.mrf.mxu0 }
0x16df   :  { %v2015_v38 = vadd.f32 %v2012_v36, %v1869_v35 }
0x16e1   :  { %v2016_v49 = vadd.f32 %v2015_v38, %v2831_v48  ;;  %v64_v48 = vld [vmem:[#allocation5 + $0x40] sm:$0xff] }
0x16e2   :  { %2427 = vmatpush3.msra.mxu0 %v64_v48 }
0x16e3   :  { %v2276_v20 = vmul.f32 -1.442695, %v2016_v49  ;;  %2428 = vmatprep.subr.mxu0 %v2734_v33 }
0x16e4   :  { %2429 = vmatpush3.msra.mxu0 %v63_v6 }
0x16e5   :  { %2621 = vpow2.f32 %v2276_v20  ;;  %2430 = vmatprep.subr.mxu0 %v2734_v33 }
0x16e6   :  { %2431 = vmatpush3.msra.mxu0 %v62_v7 }
0x16f2   :  { %v2622_v41 = vpop.eup %2621 }
0x16f3   :  { %v2020_v59 = vadd.f32 1.0, %v2622_v41 }
0x16f5   :  { %2623 = vrcp.f32 %v2020_v59 }
0x1702   :  { %v2624_v51 = vpop.eup %2623 }
0x1703   :  { %v2023_v60 = vmul.f32 2.0, %v2624_v51  ;;  %v2025_v2 = vmul.f32 %v2624_v51, %v1791_v34 }
0x1705   :  { %v2277_v61 = vadd.f32 -1.0, %v2023_v60 }
0x1707   :  { %2027 = vrot.lane.b32.xlu0 %v2277_v61, %s2733_s0 }
0x1779   :  { %v2028_v62 = vpop.permute.xlu0 %2027 }
0x177a   :  { %v2030_v0 = vmul.f32 %v2624_v51, %v2028_v62 }
0x177c   :  { %2032 = vrot.lane.b32.xlu1 %v2030_v0, %s2736_s30 }
0x17ee   :  { %v2033_v3 = vpop.permute.xlu1 %2032 }
0x17ef   :  { %v2035_v50 = vadd.f32 %v2033_v3, %v2025_v2 }
0x17f1   :  { %2625 = vtanh.f32 %v2035_v50 }
0x17fe   :  { %v2626_v8 = vpop.eup %2625 }
0x17ff   :  { %2038 = vrot.lane.b32.xlu0 %v2626_v8, %s2733_s0 }
0x1871   :  { %v2039_v14 = vpop.permute.xlu0 %2038 }
0x1872   :  { %v2041_v18 = vmul.f32 %v2624_v51, %v2039_v14 }
0x1874   :  { %2047 = vrot.lane.b32.xlu1 %v2041_v18, %s2736_s30 }
0x18e6   :  { %v2048_v26 = vpop.permute.xlu1 %2047 }
0x18e7   :  { %2433 = vmatmul.mubr.msk.f32.vlgmr.msra.gmra.mxu0 %vm228_vm2, %v2048_v26 }
0x19a7   :  { %v2117_v23 = vpop.f32.mrf.mxu0 }
0x19a8   :  { %v2118_v31 = vadd.f32 %v2117_v23, %v2045_v1 }
0x19a9   :  { %v2434_v32 = vpop.f32.mrf.mxu0 }
0x19aa   :  { %v2121_v34 = vmax.f32 %v2118_v31, 0.0 }
0x19ac   :  { %2468 = vmatmul.mubr.f32.vlgmr.msra.gmra.mxu1 %v2121_v34 }
0x1a6c   :  { %v2192_v21 = vpop.f32.mrf.mxu1 }
0x1a6d   :  { %v2193_v44 = vadd.f32 %v2192_v21, %v2125_v4 }
0x1a6e   :  { %v2469_v33 = vpop.f32.mrf.mxu1 }
0x1a6f   :  { %2196 = vst [vmem:[#allocation8] sm:$0x3] %v2193_v44 }
0x1a70   :  { %2711 = shalt.err (!%p2708_p5)
}
0x1a71   :  { %2206 = dma.vmem_to_hbm [thread:$0]  %s2204_s5, 32, %s3205_s3, [#allocation4]  }
0x1a72   :  { %2724 = dma.done.wait [#allocation4], 32  }
0x1a73   :  { %2725 = vsyncadd [#allocation4], 4294967264 }
0x1a74   :  { %2210 = vsyncpa [#allocation3], 1 }
0x1a75   :  { %2211 = vsyncpa [#allocation6], 1 }
0x1a76   :  { %2212 = vsyncpa [#allocation4], 1 }

</bundles_post_ra>
